<compile_context>
chip_gen: v5e
topology: v5e:2x2
jax: 0.10.0
libtpu: 0.0.40
codegen_flags: <defaults>
</compile_context>

<pallas_src>
import functools

import jax
import jax.numpy as jnp
from jax.experimental import pallas as pl
from jax.experimental.pallas import tpu as pltpu


def _luong_decoder_kernel(emb_ref, h0_ref, c0_ref, enc_ref,
                          w_ih_ref, w_hh_ref, b_g_ref,
                          w_ce_ref, w_cc_ref, b_c_ref,
                          logp_ref, h1_ref, c1_ref, attn_ref,
                          ctx_sc, m_sc, l_sc):
    j = pl.program_id(1)
    nj = pl.num_programs(1)

    # ---- decode step (LSTM cell + Luong 'dot' attention): once per batch tile ----
    @pl.when(j == 0)
    def _decode_step():
        emb = emb_ref[...]                          # (TB, E)  bf16
        h0 = h0_ref[...]                            # (TB, H)  f32
        c0 = c0_ref[...]                            # (TB, H)  f32
        h0b = h0.astype(jnp.bfloat16)

        # LSTM cell, PyTorch gate order [i, f, g, o]; gate weights are stacked
        # (4, in, H) so each gate is a contiguous slab -> no lane-axis slicing.
        def gate(k):
            return (jnp.dot(emb, w_ih_ref[k], preferred_element_type=jnp.float32)
                    + jnp.dot(h0b, w_hh_ref[k], preferred_element_type=jnp.float32)
                    + b_g_ref[k])                   # (TB, H) f32

        i_g = jax.nn.sigmoid(gate(0))
        f_g = jax.nn.sigmoid(gate(1))
        g_g = jnp.tanh(gate(2))
        o_g = jax.nn.sigmoid(gate(3))
        c1 = f_g * c0 + i_g * g_g                   # (TB, H)
        h1 = o_g * jnp.tanh(c1)                     # (TB, H)

        # Luong 'dot' attention via MXU batched matmuls (flash-attention pattern).
        enc = enc_ref[...]                          # (TB, S, H) bf16
        q = h1.astype(jnp.bfloat16)[:, None, :]     # (TB, 1, H)
        s = jnp.einsum('bqh,bkh->bqk', q, enc,
                       preferred_element_type=jnp.float32)      # (TB, 1, S) f32
        s_max = jnp.max(s, axis=-1, keepdims=True)
        e = jnp.exp(s - s_max)
        denom = jnp.sum(e, axis=-1, keepdims=True)
        p = e * pl.reciprocal(denom, approx=True)                # (TB, 1, S) f32
        ctx = jnp.einsum('bqk,bkh->bqh', p.astype(jnp.bfloat16), enc,
                         preferred_element_type=jnp.float32)     # (TB, 1, H) f32

        h1_ref[...] = h1
        c1_ref[...] = c1
        attn_ref[...] = p[:, 0, :]
        ctx_sc[...] = ctx[:, 0, :]
        m_sc[...] = jnp.full(m_sc.shape, -1e30, dtype=m_sc.dtype)
        l_sc[...] = jnp.zeros(l_sc.shape, dtype=l_sc.dtype)

    # ---- classifier over cat(emb, context): one vocab tile per grid step ----
    emb = emb_ref[...]                               # (TB, E)  bf16
    ctxb = ctx_sc[...].astype(jnp.bfloat16)          # (TB, H)  bf16
    logits = (jnp.dot(emb, w_ce_ref[...], preferred_element_type=jnp.float32)
              + jnp.dot(ctxb, w_cc_ref[...], preferred_element_type=jnp.float32)
              + b_c_ref[...])                        # (TB, TILE_V) f32

    # online logsumexp accumulation across vocab tiles
    t_max = jnp.max(logits, axis=-1, keepdims=True)
    m_new = jnp.maximum(m_sc[...], t_max)
    l_sc[...] = (l_sc[...] * jnp.exp(m_sc[...] - m_new)
                 + jnp.sum(jnp.exp(logits - m_new), axis=-1, keepdims=True))
    m_sc[...] = m_new

    tile_v = b_c_ref.shape[-1]
    off = pl.multiple_of(j * tile_v, tile_v)
    logp_ref[:, pl.ds(off, tile_v)] = logits         # raw logits into resident slab

    # finalize: log_softmax = logits - logsumexp, once all vocab tiles are done
    @pl.when(j == nj - 1)
    def _finalize():
        lse = m_sc[...] + jnp.log(l_sc[...])
        logp_ref[...] = logp_ref[...] - lse


def init_params(key, output_dim, emb_dim, hidden_dim):
    """Deterministic synthetic parameters with PyTorch-declared shapes."""
    ks = jax.random.split(key, 7)
    scale = 0.1
    return {
        # nn.Embedding(output_dim, emb_dim)
        "embedding": scale * jax.random.normal(ks[0], (output_dim, emb_dim), jnp.float32),
        # nn.LSTM(emb_dim, hidden_dim, 1): weight_ih_l0 (4H,E), weight_hh_l0 (4H,H)
        "w_ih": scale * jax.random.normal(ks[1], (4 * hidden_dim, emb_dim), jnp.float32),
        "w_hh": scale * jax.random.normal(ks[2], (4 * hidden_dim, hidden_dim), jnp.float32),
        "b_ih": scale * jax.random.normal(ks[3], (4 * hidden_dim,), jnp.float32),
        "b_hh": scale * jax.random.normal(ks[4], (4 * hidden_dim,), jnp.float32),
        # classifier consumes cat(emb, context) of width E+H (see TODO(synk) above)
        "w_cls": scale * jax.random.normal(ks[5], (output_dim, emb_dim + hidden_dim), jnp.float32),
        "b_cls": scale * jax.random.normal(ks[6], (output_dim,), jnp.float32),
    }


def luong_decoder_forward(tokens, hidden, encoder_outputs, params,
                          *, tile_v=128, tile_b=8):
    """tokens: (B,) int32; hidden: (h0, c0) each (1, B, H); encoder_outputs: (B, S, H).

    At realistic vocab sizes, raise tile_v to 256/512 (v6e/v7x MXU N tiles).
    """
    h0_full, c0_full = hidden
    h0 = h0_full[0]                                   # (B, H)  (n_layers = 1)
    c0 = c0_full[0]                                   # (B, H)
    B, S, H = encoder_outputs.shape
    V, E = params["embedding"].shape

    # glue in plain JAX: embedding gather; dropout (p=0 / eval) is identity
    emb = params["embedding"][tokens]                 # (B, E) f32

    # ---- pad batch to a multiple of the batch tile (sublane width 8) ----
    Bp = pl.cdiv(B, tile_b) * tile_b
    if Bp != B:
        pad_b = Bp - B
        emb = jnp.pad(emb, ((0, pad_b), (0, 0)))
        h0 = jnp.pad(h0, ((0, pad_b), (0, 0)))
        c0 = jnp.pad(c0, ((0, pad_b), (0, 0)))
        encoder_outputs = jnp.pad(encoder_outputs, ((0, pad_b), (0, 0), (0, 0)))

    # ---- pad vocab to a multiple of the vocab tile; padded logits get bias -1e30
    #      so they vanish from the logsumexp ----
    Vp = pl.cdiv(V, tile_v) * tile_v
    w_cls = params["w_cls"]                           # (V, E+H)
    b_cls = params["b_cls"]                           # (V,)
    if Vp != V:
        w_cls = jnp.pad(w_cls, ((0, Vp - V), (0, 0)))
        b_cls = jnp.pad(b_cls, ((0, Vp - V),), constant_values=-1e30)

    # ---- weight layout plumbing (free, outside the kernel) ----
    bf16 = jnp.bfloat16
    # LSTM gate weights (4H, in) -> stacked (4, in, H), PyTorch order [i, f, g, o]
    w_ih_s = jnp.transpose(params["w_ih"].reshape(4, H, E), (0, 2, 1)).astype(bf16)
    w_hh_s = jnp.transpose(params["w_hh"].reshape(4, H, H), (0, 2, 1)).astype(bf16)
    b_g = (params["b_ih"] + params["b_hh"]).reshape(4, 1, H).astype(jnp.float32)
    # classifier split into contiguous emb-part / context-part slabs
    w_cls_t = w_cls.T                                 # (E+H, Vp)
    w_ce = w_cls_t[:E].astype(bf16)                   # (E, Vp)
    w_cc = w_cls_t[E:].astype(bf16)                   # (H, Vp)
    b_c = b_cls.reshape(1, Vp).astype(jnp.float32)

    emb_b = emb.astype(bf16)
    enc_b = encoder_outputs.astype(bf16)

    grid = (Bp // tile_b, Vp // tile_v)

    cost = pl.CostEstimate(
        flops=int(2 * Bp * ((E + H) * 4 * H + 2 * S * H + (E + H) * Vp)),
        transcendentals=int(Bp * (8 * H + S + 2 * Vp)),
        bytes_accessed=int(emb_b.size * 2 + h0.size * 4 + c0.size * 4 + enc_b.size * 2
                           + w_ih_s.size * 2 + w_hh_s.size * 2 + b_g.size * 4
                           + w_ce.size * 2 + w_cc.size * 2 + b_c.size * 4
                           + Bp * Vp * 4 + 2 * Bp * H * 4 + Bp * S * 4),
    )

    logp, h1, c1, attn = pl.pallas_call(
        _luong_decoder_kernel,
        out_shape=(
            jax.ShapeDtypeStruct((Bp, Vp), jnp.float32),   # log-softmax over vocab
            jax.ShapeDtypeStruct((Bp, H), jnp.float32),    # new h
            jax.ShapeDtypeStruct((Bp, H), jnp.float32),    # new c
            jax.ShapeDtypeStruct((Bp, S), jnp.float32),    # attention weights
        ),
        grid_spec=pltpu.PrefetchScalarGridSpec(
            num_scalar_prefetch=0,
            grid=grid,
            in_specs=[
                pl.BlockSpec((tile_b, E), lambda b, j: (b, 0)),        # emb (bf16)
                pl.BlockSpec((tile_b, H), lambda b, j: (b, 0)),        # h0
                pl.BlockSpec((tile_b, H), lambda b, j: (b, 0)),        # c0
                pl.BlockSpec((tile_b, S, H), lambda b, j: (b, 0, 0)),  # enc (bf16)
                pl.BlockSpec((4, E, H), lambda b, j: (0, 0, 0)),       # w_ih stacked
                pl.BlockSpec((4, H, H), lambda b, j: (0, 0, 0)),       # w_hh stacked
                pl.BlockSpec((4, 1, H), lambda b, j: (0, 0, 0)),       # gate bias
                pl.BlockSpec((E, tile_v), lambda b, j: (0, j)),        # w_cls emb part
                pl.BlockSpec((H, tile_v), lambda b, j: (0, j)),        # w_cls ctx part
                pl.BlockSpec((1, tile_v), lambda b, j: (0, j)),        # classifier bias
            ],
            out_specs=(
                pl.BlockSpec((tile_b, Vp), lambda b, j: (b, 0)),       # logp (resident over V)
                pl.BlockSpec((tile_b, H), lambda b, j: (b, 0)),        # h1
                pl.BlockSpec((tile_b, H), lambda b, j: (b, 0)),        # c1
                pl.BlockSpec((tile_b, S), lambda b, j: (b, 0)),        # attn
            ),
            scratch_shapes=[
                pltpu.VMEM((tile_b, H), jnp.float32),   # context vector
                pltpu.VMEM((tile_b, 1), jnp.float32),   # running max (logsumexp)
                pltpu.VMEM((tile_b, 1), jnp.float32),   # running sum (logsumexp)
            ],
        ),
        compiler_params=pltpu.CompilerParams(
            dimension_semantics=("parallel", "arbitrary"),
            vmem_limit_bytes=48 * 1024 * 1024,
        ),
        cost_estimate=cost,
    )(emb_b, h0, c0, enc_b, w_ih_s, w_hh_s, b_g, w_ce, w_cc, b_c)

    logp = logp[:B, :V]
    h1 = h1[:B]
    c1 = c1[:B]
    attn = attn[:B]
    new_hidden = (h1[None], c1[None])                 # back to (n_layers=1, B, H)
    return logp, new_hidden, attn


def _ref_forward(tokens, hidden, encoder_outputs, params):
    """Pure-JAX reference with the same bf16-matmul / f32-accumulate policy."""
    bf16, f32 = jnp.bfloat16, jnp.float32
    h0, c0 = hidden[0][0], hidden[1][0]
    B, S, H = encoder_outputs.shape
    V, E = params["embedding"].shape
    emb = params["embedding"][tokens]
    embb = emb.astype(bf16)
    enc_b = encoder_outputs.astype(bf16)
    gates = (jnp.dot(embb, params["w_ih"].T.astype(bf16), preferred_element_type=f32)
             + jnp.dot(h0.astype(bf16), params["w_hh"].T.astype(bf16),
                       preferred_element_type=f32)
             + (params["b_ih"] + params["b_hh"])[None, :])
    i_g = jax.nn.sigmoid(gates[:, :H])
    f_g = jax.nn.sigmoid(gates[:, H:2 * H])
    g_g = jnp.tanh(gates[:, 2 * H:3 * H])
    o_g = jax.nn.sigmoid(gates[:, 3 * H:])
    c1 = f_g * c0 + i_g * g_g
    h1 = o_g * jnp.tanh(c1)
    scores = jnp.einsum('bsh,bh->bs', enc_b, h1.astype(bf16), preferred_element_type=f32)
    attn = jax.nn.softmax(scores, axis=-1)
    ctx = jnp.einsum('bs,bsh->bh', attn.astype(bf16), enc_b, preferred_element_type=f32)
    w_cls_t = params["w_cls"].T.astype(bf16)
    logits = (jnp.dot(embb, w_cls_t[:E], preferred_element_type=f32)
              + jnp.dot(ctx.astype(bf16), w_cls_t[E:], preferred_element_type=f32)
              + params["b_cls"][None, :])
    logp = jax.nn.log_softmax(logits, axis=-1)
    return logp, (h1[None], c1[None]), attn


if __name__ == "__main__":
    # small shapes, but TPU-friendly: B multiple of 8, vocab = 2 classifier tiles
    B, S = 16, 16               # batch (e.g. beams), source sequence length
    output_dim = 256            # vocabulary size (exercises the vocab grid axis)
    emb_dim = 32
    hidden_dim = 64

    key = jax.random.PRNGKey(0)
    k_par, k_tok, k_h, k_c, k_enc = jax.random.split(key, 5)

    params = init_params(k_par, output_dim, emb_dim, hidden_dim)

    tokens = jax.random.randint(k_tok, (B,), 0, output_dim, dtype=jnp.int32)
    h0 = jax.random.normal(k_h, (1, B, hidden_dim), jnp.float32)
    c0 = jax.random.normal(k_c, (1, B, hidden_dim), jnp.float32)
    encoder_outputs = jax.random.normal(k_enc, (B, S, hidden_dim), jnp.float32)

    fwd = jax.jit(functools.partial(luong_decoder_forward, params=params))
    logp, (h1, c1), attn = fwd(tokens, (h0, c0), encoder_outputs)
    jax.block_until_ready((logp, h1, c1, attn))

    # shape checks
    assert logp.shape == (B, output_dim)
    assert h1.shape == (1, B, hidden_dim) and c1.shape == (1, B, hidden_dim)
    assert attn.shape == (B, S)

    # normalization checks (attn uses an approx-EUP reciprocal -> looser tol)
    assert bool(jnp.allclose(jnp.sum(jnp.exp(logp), axis=-1), 1.0, atol=1e-3))
    assert bool(jnp.allclose(jnp.sum(attn, axis=-1), 1.0, atol=1e-2))

    # compare against a pure-JAX reference using the same bf16 matmul policy
    logp_r, (h1_r, c1_r), attn_r = _ref_forward(tokens, (h0, c0), encoder_outputs, params)
    assert bool(jnp.allclose(h1, h1_r, atol=2e-2, rtol=2e-2))
    assert bool(jnp.allclose(c1, c1_r, atol=2e-2, rtol=2e-2))
    assert bool(jnp.allclose(attn, attn_r, atol=2e-2, rtol=2e-2))
    assert bool(jnp.allclose(logp, logp_r, atol=5e-2, rtol=5e-2))

    print("KERNEL_OK")
</pallas_src>

<mosaic_0001>
module attributes {stable_mosaic.version = 11 : i64} {
  func.func @_luong_decoder_kernel(%arg0: i32, %arg1: i32, %arg2: memref<8x32xbf16, #tpu.memory_space<vmem>>, %arg3: memref<8x64xf32, #tpu.memory_space<vmem>>, %arg4: memref<8x64xf32, #tpu.memory_space<vmem>>, %arg5: memref<8x16x64xbf16, #tpu.memory_space<vmem>>, %arg6: memref<4x32x64xbf16, #tpu.memory_space<vmem>>, %arg7: memref<4x64x64xbf16, #tpu.memory_space<vmem>>, %arg8: memref<4x1x64xf32, #tpu.memory_space<vmem>>, %arg9: memref<32x128xbf16, #tpu.memory_space<vmem>>, %arg10: memref<64x128xbf16, #tpu.memory_space<vmem>>, %arg11: memref<1x128xf32, #tpu.memory_space<vmem>>, %arg12: memref<8x256xf32, #tpu.memory_space<vmem>>, %arg13: memref<8x64xf32, #tpu.memory_space<vmem>>, %arg14: memref<8x64xf32, #tpu.memory_space<vmem>>, %arg15: memref<8x16xf32, #tpu.memory_space<vmem>>, %arg16: memref<8x64xf32, #tpu.memory_space<vmem>>, %arg17: memref<8x1xf32, #tpu.memory_space<vmem>>, %arg18: memref<8x1xf32, #tpu.memory_space<vmem>>) attributes {dimension_semantics = [#tpu.dimension_semantics<parallel>, #tpu.dimension_semantics<arbitrary>], iteration_bounds = array<i64: 2, 2>, scalar_prefetch = 0 : i64, scratch_operands = 3 : i64, tpu.core_type = #tpu.core_type<tc>, window_params = [{transform_indices = @transform_0, window_bounds = array<i64: 8, 32>}, {transform_indices = @transform_1, window_bounds = array<i64: 8, 64>}, {transform_indices = @transform_2, window_bounds = array<i64: 8, 64>}, {transform_indices = @transform_3, window_bounds = array<i64: 8, 16, 64>}, {pipeline_mode = #tpu.pipeline_mode<synchronous>, transform_indices = @transform_4, window_bounds = array<i64: 4, 32, 64>}, {pipeline_mode = #tpu.pipeline_mode<synchronous>, transform_indices = @transform_5, window_bounds = array<i64: 4, 64, 64>}, {pipeline_mode = #tpu.pipeline_mode<synchronous>, transform_indices = @transform_6, window_bounds = array<i64: 4, 1, 64>}, {transform_indices = @transform_7, window_bounds = array<i64: 32, 128>}, {transform_indices = @transform_8, window_bounds = array<i64: 64, 128>}, {transform_indices = @transform_9, window_bounds = array<i64: 1, 128>}, {transform_indices = @transform_10, window_bounds = array<i64: 8, 256>}, {transform_indices = @transform_11, window_bounds = array<i64: 8, 64>}, {transform_indices = @transform_12, window_bounds = array<i64: 8, 64>}, {transform_indices = @transform_13, window_bounds = array<i64: 8, 16>}]} {
    %c0_i32 = arith.constant 0 : i32
    %0 = arith.cmpi eq, %arg1, %c0_i32 : i32
    %1 = arith.extui %0 : i1 to i32
    %c0_i32_0 = arith.constant 0 : i32
    %2 = arith.cmpi ne, %1, %c0_i32_0 : i32
    scf.if %2 {
      %c0_25 = arith.constant 0 : index
      %c0_26 = arith.constant 0 : index
      %38 = vector.load %arg2[%c0_25, %c0_26] : memref<8x32xbf16, #tpu.memory_space<vmem>>, vector<8x32xbf16>
      %c0_27 = arith.constant 0 : index
      %c0_28 = arith.constant 0 : index
      %39 = vector.load %arg3[%c0_27, %c0_28] : memref<8x64xf32, #tpu.memory_space<vmem>>, vector<8x64xf32>
      %c0_29 = arith.constant 0 : index
      %c0_30 = arith.constant 0 : index
      %40 = vector.load %arg4[%c0_29, %c0_30] : memref<8x64xf32, #tpu.memory_space<vmem>>, vector<8x64xf32>
      %41 = arith.truncf %39 : vector<8x64xf32> to vector<8x64xbf16>
      %c0_31 = arith.constant 0 : index
      %c0_32 = arith.constant 0 : index
      %c0_33 = arith.constant 0 : index
      %42 = vector.load %arg6[%c0_31, %c0_32, %c0_33] : memref<4x32x64xbf16, #tpu.memory_space<vmem>>, vector<1x32x64xbf16>
      %43 = vector.shape_cast %42 : vector<1x32x64xbf16> to vector<32x64xbf16>
      %cst_34 = arith.constant dense<0.000000e+00> : vector<8x64xf32>
      %44 = tpu.matmul %38, %43, %cst_34 {dimension_numbers = #tpu.dot_dimension_numbers<[1], [0], [0], [1], [0, 0, 1, 1], [], []>} : vector<8x32xbf16>, vector<32x64xbf16>, vector<8x64xf32> -> vector<8x64xf32>
      %c0_35 = arith.constant 0 : index
      %c0_36 = arith.constant 0 : index
      %c0_37 = arith.constant 0 : index
      %45 = vector.load %arg7[%c0_35, %c0_36, %c0_37] : memref<4x64x64xbf16, #tpu.memory_space<vmem>>, vector<1x64x64xbf16>
      %46 = vector.shape_cast %45 : vector<1x64x64xbf16> to vector<64x64xbf16>
      %cst_38 = arith.constant dense<0.000000e+00> : vector<8x64xf32>
      %47 = tpu.matmul %41, %46, %cst_38 {dimension_numbers = #tpu.dot_dimension_numbers<[1], [0], [0], [1], [0, 0, 1, 1], [], []>} : vector<8x64xbf16>, vector<64x64xbf16>, vector<8x64xf32> -> vector<8x64xf32>
      %48 = arith.addf %44, %47 : vector<8x64xf32>
      %c0_39 = arith.constant 0 : index
      %c0_40 = arith.constant 0 : index
      %c0_41 = arith.constant 0 : index
      %49 = vector.load %arg8[%c0_39, %c0_40, %c0_41] : memref<4x1x64xf32, #tpu.memory_space<vmem>>, vector<1x1x64xf32>
      %50 = vector.shape_cast %49 : vector<1x1x64xf32> to vector<1x64xf32>
      %51 = vector.broadcast %50 : vector<1x64xf32> to vector<8x64xf32>
      %52 = arith.addf %48, %51 : vector<8x64xf32>
      %53 = arith.negf %52 : vector<8x64xf32>
      %54 = math.exp %53 : vector<8x64xf32>
      %cst_42 = arith.constant 1.000000e+00 : f32
      %55 = vector.broadcast %cst_42 : f32 to vector<8x64xf32>
      %56 = arith.addf %55, %54 : vector<8x64xf32>
      %57 = arith.divf %55, %56 : vector<8x64xf32>
      %c1 = arith.constant 1 : index
      %c0_43 = arith.constant 0 : index
      %c0_44 = arith.constant 0 : index
      %58 = vector.load %arg6[%c1, %c0_43, %c0_44] : memref<4x32x64xbf16, #tpu.memory_space<vmem>>, vector<1x32x64xbf16>
      %59 = vector.shape_cast %58 : vector<1x32x64xbf16> to vector<32x64xbf16>
      %cst_45 = arith.constant dense<0.000000e+00> : vector<8x64xf32>
      %60 = tpu.matmul %38, %59, %cst_45 {dimension_numbers = #tpu.dot_dimension_numbers<[1], [0], [0], [1], [0, 0, 1, 1], [], []>} : vector<8x32xbf16>, vector<32x64xbf16>, vector<8x64xf32> -> vector<8x64xf32>
      %c1_46 = arith.constant 1 : index
      %c0_47 = arith.constant 0 : index
      %c0_48 = arith.constant 0 : index
      %61 = vector.load %arg7[%c1_46, %c0_47, %c0_48] : memref<4x64x64xbf16, #tpu.memory_space<vmem>>, vector<1x64x64xbf16>
      %62 = vector.shape_cast %61 : vector<1x64x64xbf16> to vector<64x64xbf16>
      %cst_49 = arith.constant dense<0.000000e+00> : vector<8x64xf32>
      %63 = tpu.matmul %41, %62, %cst_49 {dimension_numbers = #tpu.dot_dimension_numbers<[1], [0], [0], [1], [0, 0, 1, 1], [], []>} : vector<8x64xbf16>, vector<64x64xbf16>, vector<8x64xf32> -> vector<8x64xf32>
      %64 = arith.addf %60, %63 : vector<8x64xf32>
      %c1_50 = arith.constant 1 : index
      %c0_51 = arith.constant 0 : index
      %c0_52 = arith.constant 0 : index
      %65 = vector.load %arg8[%c1_50, %c0_51, %c0_52] : memref<4x1x64xf32, #tpu.memory_space<vmem>>, vector<1x1x64xf32>
      %66 = vector.shape_cast %65 : vector<1x1x64xf32> to vector<1x64xf32>
      %67 = vector.broadcast %66 : vector<1x64xf32> to vector<8x64xf32>
      %68 = arith.addf %64, %67 : vector<8x64xf32>
      %69 = arith.negf %68 : vector<8x64xf32>
      %70 = math.exp %69 : vector<8x64xf32>
      %cst_53 = arith.constant 1.000000e+00 : f32
      %71 = vector.broadcast %cst_53 : f32 to vector<8x64xf32>
      %72 = arith.addf %71, %70 : vector<8x64xf32>
      %73 = arith.divf %71, %72 : vector<8x64xf32>
      %c2 = arith.constant 2 : index
      %c0_54 = arith.constant 0 : index
      %c0_55 = arith.constant 0 : index
      %74 = vector.load %arg6[%c2, %c0_54, %c0_55] : memref<4x32x64xbf16, #tpu.memory_space<vmem>>, vector<1x32x64xbf16>
      %75 = vector.shape_cast %74 : vector<1x32x64xbf16> to vector<32x64xbf16>
      %cst_56 = arith.constant dense<0.000000e+00> : vector<8x64xf32>
      %76 = tpu.matmul %38, %75, %cst_56 {dimension_numbers = #tpu.dot_dimension_numbers<[1], [0], [0], [1], [0, 0, 1, 1], [], []>} : vector<8x32xbf16>, vector<32x64xbf16>, vector<8x64xf32> -> vector<8x64xf32>
      %c2_57 = arith.constant 2 : index
      %c0_58 = arith.constant 0 : index
      %c0_59 = arith.constant 0 : index
      %77 = vector.load %arg7[%c2_57, %c0_58, %c0_59] : memref<4x64x64xbf16, #tpu.memory_space<vmem>>, vector<1x64x64xbf16>
      %78 = vector.shape_cast %77 : vector<1x64x64xbf16> to vector<64x64xbf16>
      %cst_60 = arith.constant dense<0.000000e+00> : vector<8x64xf32>
      %79 = tpu.matmul %41, %78, %cst_60 {dimension_numbers = #tpu.dot_dimension_numbers<[1], [0], [0], [1], [0, 0, 1, 1], [], []>} : vector<8x64xbf16>, vector<64x64xbf16>, vector<8x64xf32> -> vector<8x64xf32>
      %80 = arith.addf %76, %79 : vector<8x64xf32>
      %c2_61 = arith.constant 2 : index
      %c0_62 = arith.constant 0 : index
      %c0_63 = arith.constant 0 : index
      %81 = vector.load %arg8[%c2_61, %c0_62, %c0_63] : memref<4x1x64xf32, #tpu.memory_space<vmem>>, vector<1x1x64xf32>
      %82 = vector.shape_cast %81 : vector<1x1x64xf32> to vector<1x64xf32>
      %83 = vector.broadcast %82 : vector<1x64xf32> to vector<8x64xf32>
      %84 = arith.addf %80, %83 : vector<8x64xf32>
      %85 = math.tanh %84 : vector<8x64xf32>
      %c3 = arith.constant 3 : index
      %c0_64 = arith.constant 0 : index
      %c0_65 = arith.constant 0 : index
      %86 = vector.load %arg6[%c3, %c0_64, %c0_65] : memref<4x32x64xbf16, #tpu.memory_space<vmem>>, vector<1x32x64xbf16>
      %87 = vector.shape_cast %86 : vector<1x32x64xbf16> to vector<32x64xbf16>
      %cst_66 = arith.constant dense<0.000000e+00> : vector<8x64xf32>
      %88 = tpu.matmul %38, %87, %cst_66 {dimension_numbers = #tpu.dot_dimension_numbers<[1], [0], [0], [1], [0, 0, 1, 1], [], []>} : vector<8x32xbf16>, vector<32x64xbf16>, vector<8x64xf32> -> vector<8x64xf32>
      %c3_67 = arith.constant 3 : index
      %c0_68 = arith.constant 0 : index
      %c0_69 = arith.constant 0 : index
      %89 = vector.load %arg7[%c3_67, %c0_68, %c0_69] : memref<4x64x64xbf16, #tpu.memory_space<vmem>>, vector<1x64x64xbf16>
      %90 = vector.shape_cast %89 : vector<1x64x64xbf16> to vector<64x64xbf16>
      %cst_70 = arith.constant dense<0.000000e+00> : vector<8x64xf32>
      %91 = tpu.matmul %41, %90, %cst_70 {dimension_numbers = #tpu.dot_dimension_numbers<[1], [0], [0], [1], [0, 0, 1, 1], [], []>} : vector<8x64xbf16>, vector<64x64xbf16>, vector<8x64xf32> -> vector<8x64xf32>
      %92 = arith.addf %88, %91 : vector<8x64xf32>
      %c3_71 = arith.constant 3 : index
      %c0_72 = arith.constant 0 : index
      %c0_73 = arith.constant 0 : index
      %93 = vector.load %arg8[%c3_71, %c0_72, %c0_73] : memref<4x1x64xf32, #tpu.memory_space<vmem>>, vector<1x1x64xf32>
      %94 = vector.shape_cast %93 : vector<1x1x64xf32> to vector<1x64xf32>
      %95 = vector.broadcast %94 : vector<1x64xf32> to vector<8x64xf32>
      %96 = arith.addf %92, %95 : vector<8x64xf32>
      %97 = arith.negf %96 : vector<8x64xf32>
      %98 = math.exp %97 : vector<8x64xf32>
      %cst_74 = arith.constant 1.000000e+00 : f32
      %99 = vector.broadcast %cst_74 : f32 to vector<8x64xf32>
      %100 = arith.addf %99, %98 : vector<8x64xf32>
      %101 = arith.divf %99, %100 : vector<8x64xf32>
      %102 = arith.mulf %73, %40 : vector<8x64xf32>
      %103 = arith.mulf %57, %85 : vector<8x64xf32>
      %104 = arith.addf %102, %103 : vector<8x64xf32>
      %105 = math.tanh %104 : vector<8x64xf32>
      %106 = arith.mulf %101, %105 : vector<8x64xf32>
      %c0_75 = arith.constant 0 : index
      %c0_76 = arith.constant 0 : index
      %c0_77 = arith.constant 0 : index
      %107 = vector.load %arg5[%c0_75, %c0_76, %c0_77] : memref<8x16x64xbf16, #tpu.memory_space<vmem>>, vector<8x16x64xbf16>
      %108 = arith.truncf %106 : vector<8x64xf32> to vector<8x64xbf16>
      %109 = vector.shape_cast %108 : vector<8x64xbf16> to vector<8x1x64xbf16>
      "tpu.trace_start"() <{level = 10 : i32, message = "bqh,bkh->bqk"}> : () -> ()
      %cst_78 = arith.constant dense<0.000000e+00> : vector<8x1x16xf32>
      %110 = tpu.matmul %109, %107, %cst_78 {dimension_numbers = #tpu.dot_dimension_numbers<[2], [2], [1], [1], [0, 0, 0, 1, 1, 1], [0], [0]>} : vector<8x1x64xbf16>, vector<8x16x64xbf16>, vector<8x1x16xf32> -> vector<8x1x16xf32>
      "tpu.trace_stop"() : () -> ()
      %cst_79 = arith.constant dense<0xFF800000> : vector<8x1xf32>
      %111 = vector.multi_reduction <maximumf>, %110, %cst_79 [2] : vector<8x1x16xf32> to vector<8x1xf32>
      %112 = vector.shape_cast %111 : vector<8x1xf32> to vector<8x1x1xf32>
      %113 = vector.broadcast %112 : vector<8x1x1xf32> to vector<8x1x16xf32>
      %114 = arith.subf %110, %113 : vector<8x1x16xf32>
      %115 = math.exp %114 : vector<8x1x16xf32>
      %cst_80 = arith.constant dense<0.000000e+00> : vector<8x1xf32>
      %116 = vector.multi_reduction <add>, %115, %cst_80 [2] : vector<8x1x16xf32> to vector<8x1xf32>
      %117 = vector.shape_cast %116 : vector<8x1xf32> to vector<8x1x1xf32>
      %118 = tpu.reciprocal %117 {approx = true} : vector<8x1x1xf32> -> vector<8x1x1xf32>
      %119 = vector.broadcast %118 : vector<8x1x1xf32> to vector<8x1x16xf32>
      %120 = arith.mulf %115, %119 : vector<8x1x16xf32>
      %121 = arith.truncf %120 : vector<8x1x16xf32> to vector<8x1x16xbf16>
      "tpu.trace_start"() <{level = 10 : i32, message = "bqk,bkh->bqh"}> : () -> ()
      %cst_81 = arith.constant dense<0.000000e+00> : vector<8x1x64xf32>
      %122 = tpu.matmul %121, %107, %cst_81 {dimension_numbers = #tpu.dot_dimension_numbers<[2], [1], [1], [2], [0, 0, 0, 1, 1, 2], [0], [0]>} : vector<8x1x16xbf16>, vector<8x16x64xbf16>, vector<8x1x64xf32> -> vector<8x1x64xf32>
      "tpu.trace_stop"() : () -> ()
      %c0_82 = arith.constant 0 : index
      %c0_83 = arith.constant 0 : index
      %123 = vector.load %arg13[%c0_82, %c0_83] : memref<8x64xf32, #tpu.memory_space<vmem>>, vector<8x64xf32>
      tpu.vector_store %arg13[%c0_82, %c0_83], %106 {strides = array<i32>} : memref<8x64xf32, #tpu.memory_space<vmem>>, vector<8x64xf32>,
      %c0_84 = arith.constant 0 : index
      %c0_85 = arith.constant 0 : index
      %124 = vector.load %arg14[%c0_84, %c0_85] : memref<8x64xf32, #tpu.memory_space<vmem>>, vector<8x64xf32>
      tpu.vector_store %arg14[%c0_84, %c0_85], %104 {strides = array<i32>} : memref<8x64xf32, #tpu.memory_space<vmem>>, vector<8x64xf32>,
      %125 = vector.shape_cast %120 : vector<8x1x16xf32> to vector<8x16xf32>
      %c0_86 = arith.constant 0 : index
      %c0_87 = arith.constant 0 : index
      %126 = vector.load %arg15[%c0_86, %c0_87] : memref<8x16xf32, #tpu.memory_space<vmem>>, vector<8x16xf32>
      tpu.vector_store %arg15[%c0_86, %c0_87], %125 {strides = array<i32>} : memref<8x16xf32, #tpu.memory_space<vmem>>, vector<8x16xf32>,
      %127 = vector.shape_cast %122 : vector<8x1x64xf32> to vector<8x64xf32>
      %c0_88 = arith.constant 0 : index
      %c0_89 = arith.constant 0 : index
      %128 = vector.load %arg16[%c0_88, %c0_89] : memref<8x64xf32, #tpu.memory_space<vmem>>, vector<8x64xf32>
      tpu.vector_store %arg16[%c0_88, %c0_89], %127 {strides = array<i32>} : memref<8x64xf32, #tpu.memory_space<vmem>>, vector<8x64xf32>,
      %cst_90 = arith.constant -1.000000e+30 : f32
      %129 = vector.broadcast %cst_90 : f32 to vector<8x1xf32>
      %c0_91 = arith.constant 0 : index
      %c0_92 = arith.constant 0 : index
      %130 = vector.load %arg17[%c0_91, %c0_92] : memref<8x1xf32, #tpu.memory_space<vmem>>, vector<8x1xf32>
      tpu.vector_store %arg17[%c0_91, %c0_92], %129 {strides = array<i32>} : memref<8x1xf32, #tpu.memory_space<vmem>>, vector<8x1xf32>,
      %cst_93 = arith.constant 0.000000e+00 : f32
      %131 = vector.broadcast %cst_93 : f32 to vector<8x1xf32>
      %c0_94 = arith.constant 0 : index
      %c0_95 = arith.constant 0 : index
      %132 = vector.load %arg18[%c0_94, %c0_95] : memref<8x1xf32, #tpu.memory_space<vmem>>, vector<8x1xf32>
      tpu.vector_store %arg18[%c0_94, %c0_95], %131 {strides = array<i32>} : memref<8x1xf32, #tpu.memory_space<vmem>>, vector<8x1xf32>,
    } else {
    }
    %c0 = arith.constant 0 : index
    %c0_1 = arith.constant 0 : index
    %3 = vector.load %arg2[%c0, %c0_1] : memref<8x32xbf16, #tpu.memory_space<vmem>>, vector<8x32xbf16>
    %c0_2 = arith.constant 0 : index
    %c0_3 = arith.constant 0 : index
    %4 = vector.load %arg16[%c0_2, %c0_3] : memref<8x64xf32, #tpu.memory_space<vmem>>, vector<8x64xf32>
    %5 = arith.truncf %4 : vector<8x64xf32> to vector<8x64xbf16>
    %c0_4 = arith.constant 0 : index
    %c0_5 = arith.constant 0 : index
    %6 = vector.load %arg9[%c0_4, %c0_5] : memref<32x128xbf16, #tpu.memory_space<vmem>>, vector<32x128xbf16>
    %cst = arith.constant dense<0.000000e+00> : vector<8x128xf32>
    %7 = tpu.matmul %3, %6, %cst {dimension_numbers = #tpu.dot_dimension_numbers<[1], [0], [0], [1], [0, 0, 1, 1], [], []>} : vector<8x32xbf16>, vector<32x128xbf16>, vector<8x128xf32> -> vector<8x128xf32>
    %c0_6 = arith.constant 0 : index
    %c0_7 = arith.constant 0 : index
    %8 = vector.load %arg10[%c0_6, %c0_7] : memref<64x128xbf16, #tpu.memory_space<vmem>>, vector<64x128xbf16>
    %cst_8 = arith.constant dense<0.000000e+00> : vector<8x128xf32>
    %9 = tpu.matmul %5, %8, %cst_8 {dimension_numbers = #tpu.dot_dimension_numbers<[1], [0], [0], [1], [0, 0, 1, 1], [], []>} : vector<8x64xbf16>, vector<64x128xbf16>, vector<8x128xf32> -> vector<8x128xf32>
    %10 = arith.addf %7, %9 : vector<8x128xf32>
    %c0_9 = arith.constant 0 : index
    %c0_10 = arith.constant 0 : index
    %11 = vector.load %arg11[%c0_9, %c0_10] : memref<1x128xf32, #tpu.memory_space<vmem>>, vector<1x128xf32>
    %12 = vector.broadcast %11 : vector<1x128xf32> to vector<8x128xf32>
    %13 = arith.addf %10, %12 : vector<8x128xf32>
    %cst_11 = arith.constant dense<0xFF800000> : vector<8xf32>
    %14 = vector.multi_reduction <maximumf>, %13, %cst_11 [1] : vector<8x128xf32> to vector<8xf32>
    %15 = vector.shape_cast %14 : vector<8xf32> to vector<8x1xf32>
    %c0_12 = arith.constant 0 : index
    %c0_13 = arith.constant 0 : index
    %16 = vector.load %arg17[%c0_12, %c0_13] : memref<8x1xf32, #tpu.memory_space<vmem>>, vector<8x1xf32>
    %17 = arith.maximumf %16, %15 : vector<8x1xf32>
    %c0_14 = arith.constant 0 : index
    %c0_15 = arith.constant 0 : index
    %18 = vector.load %arg18[%c0_14, %c0_15] : memref<8x1xf32, #tpu.memory_space<vmem>>, vector<8x1xf32>
    %c0_16 = arith.constant 0 : index
    %c0_17 = arith.constant 0 : index
    %19 = vector.load %arg17[%c0_16, %c0_17] : memref<8x1xf32, #tpu.memory_space<vmem>>, vector<8x1xf32>
    %20 = arith.subf %19, %17 : vector<8x1xf32>
    %21 = math.exp %20 : vector<8x1xf32>
    %22 = arith.mulf %18, %21 : vector<8x1xf32>
    %23 = vector.broadcast %17 : vector<8x1xf32> to vector<8x128xf32>
    %24 = arith.subf %13, %23 : vector<8x128xf32>
    %25 = math.exp %24 : vector<8x128xf32>
    %cst_18 = arith.constant dense<0.000000e+00> : vector<8xf32>
    %26 = vector.multi_reduction <add>, %25, %cst_18 [1] : vector<8x128xf32> to vector<8xf32>
    %27 = vector.shape_cast %26 : vector<8xf32> to vector<8x1xf32>
    %28 = arith.addf %22, %27 : vector<8x1xf32>
    %c0_19 = arith.constant 0 : index
    %c0_20 = arith.constant 0 : index
    %29 = vector.load %arg18[%c0_19, %c0_20] : memref<8x1xf32, #tpu.memory_space<vmem>>, vector<8x1xf32>
    tpu.vector_store %arg18[%c0_19, %c0_20], %28 {strides = array<i32>} : memref<8x1xf32, #tpu.memory_space<vmem>>, vector<8x1xf32>,
    %c0_21 = arith.constant 0 : index
    %c0_22 = arith.constant 0 : index
    %30 = vector.load %arg17[%c0_21, %c0_22] : memref<8x1xf32, #tpu.memory_space<vmem>>, vector<8x1xf32>
    tpu.vector_store %arg17[%c0_21, %c0_22], %17 {strides = array<i32>} : memref<8x1xf32, #tpu.memory_space<vmem>>, vector<8x1xf32>,
    %c128_i32 = arith.constant 128 : i32
    %31 = arith.muli %arg1, %c128_i32 : i32
    %32 = tpu.assume_multiple %31, 128 : i32
    %c0_23 = arith.constant 0 : index
    %33 = arith.index_cast %32 : i32 to index
    %34 = vector.load %arg12[%c0_23, %33] : memref<8x256xf32, #tpu.memory_space<vmem>>, vector<8x128xf32>
    tpu.vector_store %arg12[%c0_23, %33], %13 {strides = array<i32>} : memref<8x256xf32, #tpu.memory_space<vmem>>, vector<8x128xf32>,
    %c1_i32 = arith.constant 1 : i32
    %35 = arith.cmpi eq, %arg1, %c1_i32 : i32
    %36 = arith.extui %35 : i1 to i32
    %c0_i32_24 = arith.constant 0 : i32
    %37 = arith.cmpi ne, %36, %c0_i32_24 : i32
    scf.if %37 {
      %c0_25 = arith.constant 0 : index
      %c0_26 = arith.constant 0 : index
      %38 = vector.load %arg17[%c0_25, %c0_26] : memref<8x1xf32, #tpu.memory_space<vmem>>, vector<8x1xf32>
      %c0_27 = arith.constant 0 : index
      %c0_28 = arith.constant 0 : index
      %39 = vector.load %arg18[%c0_27, %c0_28] : memref<8x1xf32, #tpu.memory_space<vmem>>, vector<8x1xf32>
      %40 = math.log %39 : vector<8x1xf32>
      %41 = arith.addf %38, %40 : vector<8x1xf32>
      %c0_29 = arith.constant 0 : index
      %c0_30 = arith.constant 0 : index
      %42 = vector.load %arg12[%c0_29, %c0_30] : memref<8x256xf32, #tpu.memory_space<vmem>>, vector<8x256xf32>
      %43 = vector.broadcast %41 : vector<8x1xf32> to vector<8x256xf32>
      %44 = arith.subf %42, %43 : vector<8x256xf32>
      %c0_31 = arith.constant 0 : index
      %c0_32 = arith.constant 0 : index
      %45 = vector.load %arg12[%c0_31, %c0_32] : memref<8x256xf32, #tpu.memory_space<vmem>>, vector<8x256xf32>
      tpu.vector_store %arg12[%c0_31, %c0_32], %44 {strides = array<i32>} : memref<8x256xf32, #tpu.memory_space<vmem>>, vector<8x256xf32>,
    } else {
    }
    return
  }
  func.func @transform_0(%arg0: i32, %arg1: i32) -> (i32, i32) {
    %c0_i32 = arith.constant 0 : i32
    %c0_i32_0 = arith.constant 0 : i32
    return %arg0, %c0_i32 : i32, i32
  }
  func.func @transform_1(%arg0: i32, %arg1: i32) -> (i32, i32) {
    %c0_i32 = arith.constant 0 : i32
    %c0_i32_0 = arith.constant 0 : i32
    return %arg0, %c0_i32 : i32, i32
  }
  func.func @transform_2(%arg0: i32, %arg1: i32) -> (i32, i32) {
    %c0_i32 = arith.constant 0 : i32
    %c0_i32_0 = arith.constant 0 : i32
    return %arg0, %c0_i32 : i32, i32
  }
  func.func @transform_3(%arg0: i32, %arg1: i32) -> (i32, i32, i32) {
    %c0_i32 = arith.constant 0 : i32
    %c0_i32_0 = arith.constant 0 : i32
    %c0_i32_1 = arith.constant 0 : i32
    return %arg0, %c0_i32, %c0_i32_0 : i32, i32, i32
  }
  func.func @transform_4(%arg0: i32, %arg1: i32) -> (i32, i32, i32) {
    %c0_i32 = arith.constant 0 : i32
    %c0_i32_0 = arith.constant 0 : i32
    %c0_i32_1 = arith.constant 0 : i32
    %c0_i32_2 = arith.constant 0 : i32
    return %c0_i32, %c0_i32_0, %c0_i32_1 : i32, i32, i32
  }
  func.func @transform_5(%arg0: i32, %arg1: i32) -> (i32, i32, i32) {
    %c0_i32 = arith.constant 0 : i32
    %c0_i32_0 = arith.constant 0 : i32
    %c0_i32_1 = arith.constant 0 : i32
    %c0_i32_2 = arith.constant 0 : i32
    return %c0_i32, %c0_i32_0, %c0_i32_1 : i32, i32, i32
  }
  func.func @transform_6(%arg0: i32, %arg1: i32) -> (i32, i32, i32) {
    %c0_i32 = arith.constant 0 : i32
    %c0_i32_0 = arith.constant 0 : i32
    %c0_i32_1 = arith.constant 0 : i32
    %c0_i32_2 = arith.constant 0 : i32
    return %c0_i32, %c0_i32_0, %c0_i32_1 : i32, i32, i32
  }
  func.func @transform_7(%arg0: i32, %arg1: i32) -> (i32, i32) {
    %c0_i32 = arith.constant 0 : i32
    %c0_i32_0 = arith.constant 0 : i32
    return %c0_i32, %arg1 : i32, i32
  }
  func.func @transform_8(%arg0: i32, %arg1: i32) -> (i32, i32) {
    %c0_i32 = arith.constant 0 : i32
    %c0_i32_0 = arith.constant 0 : i32
    return %c0_i32, %arg1 : i32, i32
  }
  func.func @transform_9(%arg0: i32, %arg1: i32) -> (i32, i32) {
    %c0_i32 = arith.constant 0 : i32
    %c0_i32_0 = arith.constant 0 : i32
    return %c0_i32, %arg1 : i32, i32
  }
  func.func @transform_10(%arg0: i32, %arg1: i32) -> (i32, i32) {
    %c0_i32 = arith.constant 0 : i32
    %c0_i32_0 = arith.constant 0 : i32
    return %arg0, %c0_i32 : i32, i32
  }
  func.func @transform_11(%arg0: i32, %arg1: i32) -> (i32, i32) {
    %c0_i32 = arith.constant 0 : i32
    %c0_i32_0 = arith.constant 0 : i32
    return %arg0, %c0_i32 : i32, i32
  }
  func.func @transform_12(%arg0: i32, %arg1: i32) -> (i32, i32) {
    %c0_i32 = arith.constant 0 : i32
    %c0_i32_0 = arith.constant 0 : i32
    return %arg0, %c0_i32 : i32, i32
  }
  func.func @transform_13(%arg0: i32, %arg1: i32) -> (i32, i32) {
    %c0_i32 = arith.constant 0 : i32
    %c0_i32_0 = arith.constant 0 : i32
    return %arg0, %c0_i32 : i32, i32
  }
}

</mosaic_0001>

<bundles_post_ra>
// kernel: luong_decoder_forward.1
= control target key start
LH: loop header
LB: loop body
LE: loop exit
PB: predicated region body
PF: predicated region fallthrough
CT: control target
= control target key end

     0   :  { %s3374_s0 = inlined_call_operand.vmem [shape: bf16[16,32], index: 0, kind: input, shape index: {}]   ;;  %s3375_s1 = inlined_call_operand.vmem [shape: f32[16,64], index: 1, kind: input, shape index: {}]   ;;  %s3376_s2 = inlined_call_operand.vmem [shape: f32[16,64], index: 2, kind: input, shape index: {}]   ;;  %s3377_s3 = inlined_call_operand.vmem [shape: bf16[16,16,64], index: 3, kind: input, shape index: {}]   ;;  %s3378_s4 = inlined_call_operand.vmem [shape: bf16[4,32,64], index: 4, kind: input, shape index: {}]   ;;  %s3379_s5 = inlined_call_operand.vmem [shape: bf16[4,64,64], index: 5, kind: input, shape index: {}]   ;;  %s3380_s6 = inlined_call_operand.vmem [shape: f32[4,1,64], index: 6, kind: input, shape index: {}]   ;;  %s3381_s7 = inlined_call_operand.vmem [shape: bf16[32,256], index: 7, kind: input, shape index: {}]   ;;  %s3382_s8 = inlined_call_operand.vmem [shape: bf16[64,256], index: 8, kind: input, shape index: {}]   ;;  %s3383_s9 = inlined_call_operand.vmem [shape: f32[1,256], index: 9, kind: input, shape index: {}]   ;;  %s3384_s10 = inlined_call_operand.hbm [shape: f32[16,256], index: 10, kind: output, shape index: {0}]   ;;  %s3385_s11 = inlined_call_operand.hbm [shape: f32[16,64], index: 11, kind: output, shape index: {1}]   ;;  %s3386_s12 = inlined_call_operand.hbm [shape: f32[16,64], index: 12, kind: output, shape index: {2}]   ;;  %s3387_s13 = inlined_call_operand.hbm [shape: f32[16,16], index: 13, kind: output, shape index: {3}]  }
   0x1   :  { %3409 = sst [smem:[#allocation32_spill]] %s3374_s0 }
   0x2   :  { %3410 = sst [smem:[#allocation33_spill]] %s3375_s1 }
   0x3   :  { %3411 = sst [smem:[#allocation34_spill]] %s3376_s2 }
   0x4   :  { %3412 = sst [smem:[#allocation35_spill]] %s3377_s3 }
   0x5   :  { %3413 = sst [smem:[#allocation36_spill]] %s3381_s7 }
   0x6   :  { %3414 = sst [smem:[#allocation37_spill]] %s3382_s8 }
   0x7   :  { %3415 = sst [smem:[#allocation38_spill]] %s3384_s10 }
   0x8   :  { %3416 = sst [smem:[#allocation39_spill]] %s3385_s11 }
   0x9   :  { %3417 = sst [smem:[#allocation40_spill]] %s3386_s12 }
   0xa   :  { %3418 = sst [smem:[#allocation41_spill]] %s3387_s13 }
   0xb   :  { %19 = vsyncpa [#allocation8], 0 }
   0xc   :  { %21 = vsyncpa [#allocation8 + $0x1], 0 }
   0xd   :  { %22 = vsyncpa [#allocation10], 0 }
   0xe   :  { %24 = vsyncpa [#allocation10 + $0x1], 0 }
   0xf   :  { %25 = vsyncpa [#allocation13], 0 }
  0x10   :  { %27 = vsyncpa [#allocation13 + $0x1], 0  ;;  %s2870_s25 = smov 0   ;;  %s2872_s26 = smov 0  }
  0x11   :  { %s2874_s27 = smov 0   ;;  %s2876_s28 = smov 0  }
  0x12   :  { %s2878_s29 = smov 0   ;;  %s2880_s30 = smov 0  }
  0x13   :  { %s2882_s14 = smov 0   ;;  %s2884_s15 = smov 0  }
  0x14   :  { %s2886_s16 = smov 0   ;;  %s2888_s17 = smov 0  }
  0x15 LB: > { %3419 = sst [smem:[#allocation17_spill]] %s2758_s25  ;;  %s42_s20 = sadd.s32 1, %s2786_s15  ;;  %s2794_s17 = sphi %s2888_s17, %s33_s17   ;;  %s2790_s16 = sphi %s2886_s16, %s3470_s16   ;;  %s2786_s15 = sphi %s2884_s15, %s3469_s15   ;;  %s2782_s14 = sphi %s2882_s14, %s3468_s14   ;;  %s2778_s30 = sphi %s2880_s30, %s3467_s30   ;;  %s2774_s29 = sphi %s2878_s29, %s3466_s29   ;;  %s2770_s28 = sphi %s2876_s28, %s3465_s28   ;;  %s2766_s27 = sphi %s2874_s27, %s3464_s27   ;;  %s2762_s26 = sphi %s2872_s26, %s3463_s26   ;;  %s2758_s25 = sphi %s2870_s25, %s3462_s25  }
  0x16   : > { %3420 = sst [smem:[#allocation18_spill]] %s2762_s26  ;;  %s45_s21 = sadd.s32 1, %s2790_s16 }
  0x17   : > { %3421 = sst [smem:[#allocation19_spill]] %s2766_s27  ;;  %p43_p0 = scmp.ge.s32.totalorder %s42_s20, 2 }
  0x18   : > { %3422 = sst [smem:[#allocation20_spill]] %s2774_s29  ;;  %s219_s22 = sadd.s32 1, %s2774_s29 }
  0x19   : > { %3423 = sst [smem:[#allocation21_spill]] %s2782_s14  ;;  %p226_p1 = scmp.ne.s32.totalorder %s2774_s29, %s2770_s28 }
  0x1a   : > { %3424 = sst [smem:[#allocation22_spill]] %s2786_s15  ;;  %p227_p2 = scmp.eq.s32.totalorder %s2794_s17, 0 }
  0x1b   : > { %3425 = sst [smem:[#allocation23_spill]] %s2790_s16  ;;  %s3472_s20 = smov (%p43_p0, %s42_s20), 0 }
  0x1c   : > { %3426 = sst [smem:[#allocation24_spill]] %s3472_s20  ;;  %s3474_s21 = smov (!%p43_p0, %s45_s21), %s2790_s16 }
  0x1d   : > { %s216_s23 = ssub.s32 %s2786_s15, %s3472_s20  ;;  %p2933_p3 = por %p227_p2, %p226_p1 }
  0x1e   : > { %p47_p4 = scmp.ge.s32.totalorder %s3474_s21, 2  ;;  %p217_p5 = scmp.eq.s32.totalorder %s216_s23, 0 }
  0x1f   : > { %s297_s19 = sadd.s32 1, %s2766_s27  ;;  %p307_p6 = scmp.ne.s32.totalorder %s2766_s27, %s2762_s26 }
  0x20   : > { %s3476_s21 = smov (%p47_p4, %s3474_s21), 0  ;;  %s3430_s12 = sadd.s32 4294967295, %s2794_s17  }
  0x21   : > { %3428 = sst [smem:[#allocation25_spill]] %s3476_s21  ;;  %s294_s13 = ssub.s32 %s2790_s16, %s3476_s21 }
  0x22   : > { %s2943_s18 = scalar_select %p217_p5, %s2774_s29, %s219_s22  }
  0x23   : > { %p308_p7 = scmp.eq.s32.totalorder %s3430_s12, 3  ;;  %p295_p8 = scmp.eq.s32.totalorder %s294_s13, 0 }
  0x24   : > { %3429 = sst [smem:[#allocation26_spill]] %s2943_s18  ;;  %p313_p9 = scmp.ne.s32.totalorder %s2762_s26, %s2758_s25 }
  0x25   : > { %p2951_p10 = por %p308_p7, %p307_p6  ;;  %s3433_s10 = sadd.s32 4294967294, %s2794_s17  }
  0x26   : > { %p314_p11 = scmp.eq.s32.totalorder %s3433_s10, 3  ;;  %p2128_p13 = scmp.ge.s32.totalorder %s2794_s17, 4 }
  0x27   : > { %s3431_s20 = scalar_select %p2951_p10, 1, 0 }
  0x28   : > { %s2958_s11 = scalar_select %p295_p8, %s2766_s27, %s297_s19  }
  0x29   : > { %3432 = sst [smem:[#allocation27_spill]] %s3431_s20  ;;  %p2960_p12 = por %p314_p11, %p313_p9 }
  0x2a   : > { %3434 = sst [smem:[#allocation28_spill]] %s2958_s11  ;;  %417 = sbr.rel (%p2128_p13) target bundleno = 79 (0x4f), region = 28 }
  0x2b   : > { %s3435_s23 = scalar_select %p2960_p12, 1, 0 }
  0x2d   : > { %3436 = sst [smem:[#allocation29_spill]] %s3435_s23 }
  0x2f   : > { %451 = sbr.rel (!%p2933_p3) target bundleno = 61 (0x3d), region = 48  ;;  %s453_s12 = sand.u32 (%p2933_p3), 1, %s2774_s29  }
  0x30   : > { %s2130_s13 = sshll.u32 (%p2933_p3), %s2786_s15, 2  ;;  %s2129_s22 = sshll.u32 (%p2933_p3), %s453_s12, 4 }
  0x31   : > { %s3437_s7 = sld [smem:[#allocation36_spill]] (%p2933_p3)  ;;  %s455_s19 = scalar_lea.vmem (%p2933_p3), [#allocation5], %s2129_s22 }
  0x37   : > { %s457_s10 = scalar_lea.vmem %s3437_s7, %s2130_s13 }
  0x38   : > { %v474_v0 = vld [vmem:[%s457_s10] sm:$0xf]  ;;  %v476_v1 = vld [vmem:[%s457_s10 + $0x8] sm:$0xf]  ;;  %v478_v2 = vld [vmem:[%s457_s10 + $0x10] sm:$0xf] }
  0x39   : > { %475 = vst [vmem:[%s455_s19] sm:$0xf] %v474_v0  ;;  %v480_v3 = vld [vmem:[%s457_s10 + $0x18] sm:$0xf] }
  0x3a   : > { %477 = vst [vmem:[%s455_s19 + $0x4] sm:$0xf] %v476_v1 }
  0x3b   : > { %479 = vst [vmem:[%s455_s19 + $0x8] sm:$0xf] %v478_v2 }
  0x3c   : > { %481 = vst [vmem:[%s455_s19 + $0xc] sm:$0xf] %v480_v3 }
  0x3d PF: > { %513 = sbr.rel (!%p2933_p3) target bundleno = 79 (0x4f), region = 89  ;;  %s515_s12 = sand.u32 (%p2933_p3), 1, %s2774_s29  }
  0x3e   : > { %s2132_s18 = sshll.u32 (%p2933_p3), %s2786_s15, 2  ;;  %s2131_s11 = sshll.u32 (%p2933_p3), %s515_s12, 5 }
  0x3f   : > { %s3438_s8 = sld [smem:[#allocation37_spill]] (%p2933_p3)  ;;  %s517_s22 = scalar_lea.vmem (%p2933_p3), [#allocation6], %s2131_s11 }
  0x45   : > { %s519_s13 = scalar_lea.vmem %s3438_s8, %s2132_s18 }
  0x46   : > { %v536_v4 = vld [vmem:[%s519_s13] sm:$0xf]  ;;  %v538_v5 = vld [vmem:[%s519_s13 + $0x8] sm:$0xf]  ;;  %v540_v6 = vld [vmem:[%s519_s13 + $0x10] sm:$0xf] }
  0x47   : > { %537 = vst [vmem:[%s517_s22] sm:$0xf] %v536_v4  ;;  %v542_v7 = vld [vmem:[%s519_s13 + $0x18] sm:$0xf]  ;;  %v544_v8 = vld [vmem:[%s519_s13 + $0x20] sm:$0xf] }
  0x48   : > { %539 = vst [vmem:[%s517_s22 + $0x4] sm:$0xf] %v538_v5  ;;  %v546_v9 = vld [vmem:[%s519_s13 + $0x28] sm:$0xf]  ;;  %v548_v10 = vld [vmem:[%s519_s13 + $0x30] sm:$0xf] }
  0x49   : > { %541 = vst [vmem:[%s517_s22 + $0x8] sm:$0xf] %v540_v6  ;;  %v550_v11 = vld [vmem:[%s519_s13 + $0x38] sm:$0xf] }
  0x4a   : > { %543 = vst [vmem:[%s517_s22 + $0xc] sm:$0xf] %v542_v7 }
  0x4b   : > { %545 = vst [vmem:[%s517_s22 + $0x10] sm:$0xf] %v544_v8 }
  0x4c   : > { %547 = vst [vmem:[%s517_s22 + $0x14] sm:$0xf] %v546_v9 }
  0x4d   : > { %549 = vst [vmem:[%s517_s22 + $0x18] sm:$0xf] %v548_v10 }
  0x4e   : > { %551 = vst [vmem:[%s517_s22 + $0x1c] sm:$0xf] %v550_v11 }
  0x4f PF: > { %p2133_p0 = scmp.ge.s32.totalorder %s2794_s17, 1  ;;  %p596_p1 = scmp.lt.s32.totalorder %s2794_s17, 5 }
  0x51   : > { %p597_p2 = pnand %p2133_p0, %p596_p1 }
  0x53   : > { %600 = sbr.rel (%p597_p2) target bundleno = 1593 (0x639), region = 134 }
  0x58   : > { %s603_s11 = sand.u32 1, %s2770_s28   ;;  %s2983_s18 = sand.u32 1, %s2762_s26  }
  0x59   : > { %3439 = sst [smem:[#allocation30_spill]] %s2983_s18  ;;  %s2985_s24 = sshll.u32 %s603_s11, 4 }
  0x5a   : > { %s2135_s10 = sshll.u32 %s603_s11, 5  ;;  %s2136_s19 = sshll.u32 %s2983_s18, 4 }
  0x5b   : > { %s2989_s12 = sshll.u32 %s2983_s18, 3  ;;  %p693_p3 = scmp.lt.s32.totalorder %s2782_s14, 1 }
  0x5c   : > { %s2993_s16 = sshll.u32 %s2782_s14, 3  ;;  %p712_p5 = scmp.lt.s32.totalorder %s2778_s30, 1 }
  0x5d   : > { %3440 = sst [smem:[#allocation31_spill]] %s2993_s16  ;;  %p706_p4 = scmp.lt.s32.totalorder %s2993_s16, 15 }
  0x5e   : > { %s694_s28 = scalar_select %p693_p3, %s2782_s14, 1 }
  0x5f   : > { %s707_s21 = scalar_select %p706_p4, %s2993_s16, 15 }
  0x60   : > { %s2140_s13 = sshll.u32 %s694_s28, 2  ;;  %s2141_s22 = sshll.u32 %s694_s28, 3 }
  0x61   : > { %s3441_s0 = sld [smem:[#allocation32_spill]]  ;;  %s2385_s18 = sshll.u32 %s707_s21, 3 }
  0x62   : > { %s3442_s1 = sld [smem:[#allocation33_spill]]  ;;  %s3027_s11 = scalar_lea.vmem [#allocation6], %s2135_s10 }
  0x63   : > { %s3443_s2 = sld [smem:[#allocation34_spill]]  ;;  %s678_s26 = scalar_lea.vmem [#allocation9], %s2989_s12 }
  0x64   : > { %s3444_s3 = sld [smem:[#allocation35_spill]]  ;;  %s685_s23 = scalar_lea.vmem [#allocation11], %s2989_s12 }
  0x65   : > { %s3020_s16 = scalar_select %p712_p5, %s2778_s30, 1 }
  0x66   : > { %s3408_s21 = scalar_lea.vmem [#allocation12], %s2989_s12  ;;  %p2146_p6 = scmp.ne.s32.totalorder %s2778_s30, 0 }
  0x67   : > { %s3002_s8 = scalar_lea.vmem %s3441_s0, %s2140_s13  ;;  %s3029_s0 = scalar_lea.vmem [#allocation7], %s2136_s19 }
  0x68   : > { %s3007_s27 = scalar_lea.vmem %s3442_s1, %s2141_s22  ;;  %719 = sbr.rel (%p2146_p6) target bundleno = 871 (0x367), region = 146 }
  0x69   : > { %s3012_s25 = scalar_lea.vmem %s3443_s2, %s2141_s22 }
  0x6a   : > { %s3017_s28 = scalar_lea.vmem %s3444_s3, %s2385_s18 }
  0x6d   : > { %v2391_v12 = vld [vmem:[%s3379_s5 + $0x18] sm:$0xff]  ;;  %v2390_v15 = vld [vmem:[%s3379_s5 + $0x10] sm:$0xff]  ;;  %v2387_v17 = vld [vmem:[%s3378_s4 + $0x8] sm:$0xff]  ;;  %vm789_vm0 = vcmask 261120   ;;  %vm760_vm1 = vcmask 523264   ;;  %vm1139_vm14 = vcmask 1040384  }
  0x6e   : > { %v2397_v13 = vld [vmem:[%s3379_s5 + $0x38] sm:$0xff]  ;;  %768 = vmatpush.bf16.msra.mxu0 %v2391_v12  ;;  %v2396_v16 = vld [vmem:[%s3379_s5 + $0x30] sm:$0xff]  ;;  %799 = vmatpush.bf16.msra.mxu1 %v2387_v17  ;;  %v2386_v19 = vld [vmem:[%s3378_s4] sm:$0xff]  ;;  %vm1144_vm15 = vcmask 1041409  }
  0x6f   : > { %v2393_v14 = vld [vmem:[%s3378_s4 + $0x18] sm:$0xff]  ;;  %872 = vmatpush.bf16.msra.mxu2 %v2397_v13  ;;  %v2392_v18 = vld [vmem:[%s3378_s4 + $0x10] sm:$0xff]  ;;  %v2389_v21 = vld [vmem:[%s3379_s5 + $0x8] sm:$0xff] }
  0x70   : > { %899 = vmatpush.bf16.msra.mxu3 %v2393_v14  ;;  %v2403_v20 = vld [vmem:[%s3379_s5 + $0x58] sm:$0xff]  ;;  %v2395_v22 = vld [vmem:[%s3379_s5 + $0x28] sm:$0xff]  ;;  %v720_v24 = vld [vmem:[%s3002_s8] sm:$0xf] }
  0x71   : > { %v2399_v23 = vld [vmem:[%s3378_s4 + $0x28] sm:$0xff]  ;;  %v2402_v25 = vld [vmem:[%s3379_s5 + $0x50] sm:$0xff]  ;;  %v2398_v26 = vld [vmem:[%s3378_s4 + $0x20] sm:$0xff] }
  0x72   : > { %769 = vmatpush.bf16.msra.mxu0 %v2390_v15  ;;  %800 = vmatpush.bf16.msra.mxu1 %v2386_v19  ;;  %v2388_v27 = vld [vmem:[%s3379_s5] sm:$0xff]  ;;  %v2405_v30 = vld [vmem:[%s3378_s4 + $0x38] sm:$0xff]  ;;  %v2401_v33 = vld [vmem:[%s3379_s5 + $0x48] sm:$0xff] }
  0x73   : > { %873 = vmatpush.bf16.msra.mxu2 %v2396_v16  ;;  %v2394_v28 = vld [vmem:[%s3379_s5 + $0x20] sm:$0xff]  ;;  %v2409_v31 = vld [vmem:[%s3379_s5 + $0x78] sm:$0xff]  ;;  %v2408_v34 = vld [vmem:[%s3379_s5 + $0x70] sm:$0xff] }
  0x74   : > { %900 = vmatpush.bf16.msra.mxu3 %v2392_v18  ;;  %v721_v29 = vld [vmem:[%s3007_s27] sm:$0xff]  ;;  %v2404_v35 = vld [vmem:[%s3378_s4 + $0x30] sm:$0xff]  ;;  %v2407_v37 = vld [vmem:[%s3379_s5 + $0x68] sm:$0xff] }
  0x75   : > { %2172 = vmatmul.msk.bf16.vlgmr.msra.gmra.mxu1 %vm789_vm0, %v720_v24  ;;  %v723_v32 = vpack.c.bf16 %v721_v29, %v721_v29  ;;  %v2400_v36 = vld [vmem:[%s3379_s5 + $0x40] sm:$0xff]  ;;  %v3130_v10 = vld [vmem:[%s3017_s28 + $0x8] sm:$0xff]  ;;  %v3136_v12 = vld [vmem:[%s3017_s28 + $0x18] sm:$0xff] }
  0x76   : > { %973 = vmatpush.bf16.msrb.mxu1 %v2403_v20  ;;  %770 = vmatpush.bf16.msra.mxu0 %v2389_v21  ;;  %v2406_v38 = vld [vmem:[%s3379_s5 + $0x60] sm:$0xff]  ;;  %v3139_v14 = vld [vmem:[%s3017_s28 + $0x10] sm:$0xff]  ;;  %v1201_v17 = vsel %vm760_vm1, %v3130_v10, 0  ;;  %v1253_v20 = vsel %vm760_vm1, %v3136_v12, 0 }
  0x77   : > { %874 = vmatpush.bf16.msra.mxu2 %v2395_v22  ;;  %2211 = vmatmul.msk.bf16.vlgmr.msra.gmra.mxu3 %vm789_vm0, %v720_v24  ;;  %v2531_v40 = vld [vmem:[%s3380_s6] ss:$0 sm:$0xff]  ;;  %v2532_v47 = vld [vmem:[%s3380_s6 + $0x1] ss:$0 sm:$0xff]  ;;  %v2534_v63 = vld [vmem:[%s3380_s6 + $0x3] ss:$0 sm:$0xff] }
  0x78   : > { %1000 = vmatpush.bf16.msrb.mxu3 %v2399_v23  ;;  %v2533_v2 = vld [vmem:[%s3380_s6 + $0x2] ss:$0 sm:$0xff]  ;;  %v1227_v21 = vsel %vm760_vm1, %v3139_v14, 0 }
  0x79   : > { %v3133_v11 = vld [vmem:[%s3017_s28] sm:$0xff] }
  0x7a   : > { %974 = vmatpush.bf16.msrb.mxu1 %v2402_v25  ;;  %771 = vmatpush.bf16.msra.mxu0 %v2388_v27  ;;  %v1175_v18 = vsel %vm760_vm1, %v3133_v11, 0 }
  0x7b   : > { %875 = vmatpush.bf16.msra.mxu2 %v2394_v28 }
  0x7c   : > { %1001 = vmatpush.bf16.msrb.mxu3 %v2398_v26 }
  0x7d   : > { %2163 = vmatmul.msk.bf16.vlgmr.msra.gmra.mxu0 %vm760_vm1, %v723_v32 }
  0x7e   : > { %1056 = vmatpush.bf16.msrb.mxu0 %v2409_v31  ;;  %2202 = vmatmul.msk.bf16.vlgmr.msra.gmra.mxu2 %vm760_vm1, %v723_v32 }
  0x7f   : > { %1083 = vmatpush.bf16.msrb.mxu2 %v2405_v30  ;;  %975 = vmatpush.bf16.msrb.mxu1 %v2401_v33 }
  0x80   : > { %1210 = vmatpush.bf16.xpose.msra.mxu3 %v1201_v17 }
  0x82   : > { %1057 = vmatpush.bf16.msrb.mxu0 %v2408_v34 }
  0x83   : > { %1084 = vmatpush.bf16.msrb.mxu2 %v2404_v35  ;;  %976 = vmatpush.bf16.msrb.mxu1 %v2400_v36 }
  0x86   : > { %1058 = vmatpush.bf16.msrb.mxu0 %v2407_v37  ;;  %2242 = vmatmul.msk.bf16.vlgmr.msrb.gmra.mxu1 %vm760_vm1, %v723_v32  ;;  %v722_v37 = vld [vmem:[%s3012_s25] sm:$0xff] }
  0x87   : > { %2251 = vmatmul.msk.bf16.vlgmr.msrb.gmra.mxu3 %vm789_vm0, %v720_v24  ;;  %1184 = vmatpush.bf16.xpose.msra.mxu1 %v1175_v18 }
  0x88   : > { %1262 = vmatpush.bf16.xpose.msra.mxu2 %v1253_v20 }
  0x8a   : > { %1059 = vmatpush.bf16.msrb.mxu0 %v2406_v38 }
  0x8d   : > { %2281 = vmatmul.msk.bf16.vlgmr.msrb.gmra.mxu0 %vm760_vm1, %v723_v32 }
  0x8e   : > { %2290 = vmatmul.msk.bf16.vlgmr.msrb.gmra.mxu2 %vm789_vm0, %v720_v24  ;;  %1236 = vmatpush.bf16.xpose.msra.mxu0 %v1227_v21  ;;  %vm1148_vm0 = vcmask 1042434  }
  0xf2   : > { %v802_v39 = vpop.f32.mrf.mxu1 }
  0xfa   : > { %v773_v41 = vpop.f32.mrf.mxu0  ;;  %v902_v42 = vpop.f32.mrf.mxu3 }
  0xfb   : > { %v803_v43 = vadd.f32 %v802_v39, %v773_v41  ;;  %v804_v44 = vpop.f32.mrf.mxu1 }
  0xfc   : > { %v3158_v44 = vld [vmem:[%s3017_s28 + $0x38] sm:$0xff] }
  0xfd   : > { %v810_v45 = vadd.f32 %v2531_v40, %v803_v43  ;;  %v3152_v40 = vld [vmem:[%s3017_s28 + $0x28] sm:$0xff]  ;;  %v3155_v43 = vld [vmem:[%s3017_s28 + $0x20] sm:$0xff] }
  0xff   : > { %v2173_v46 = vmul.f32 -1.442695, %v810_v45  ;;  %v3161_v45 = vld [vmem:[%s3017_s28 + $0x30] sm:$0xff] }
 0x101   : > { %v877_v48 = vpop.f32.mrf.mxu2  ;;  %2535 = vpow2.f32 %v2173_v46 }
 0x102   : > { %v903_v49 = vadd.f32 %v902_v42, %v877_v48  ;;  %v775_v50 = vpop.f32.mrf.mxu0  ;;  %v904_v51 = vpop.f32.mrf.mxu3  ;;  %v1305_v48 = vsel %vm760_vm1, %v3152_v40, 0 }
 0x103   : > { %v978_v54 = vpop.f32.mrf.mxu1  ;;  %1314 = vmatpush.bf16.xpose.msrb.mxu3 %v1305_v48  ;;  %v1357_v50 = vsel %vm760_vm1, %v3158_v44, 0  ;;  %v1331_v51 = vsel %vm760_vm1, %v3161_v45, 0 }
 0x104   : > { %v911_v52 = vadd.f32 %v2532_v47, %v903_v49  ;;  %v1279_v49 = vsel %vm760_vm1, %v3155_v43, 0  ;;  %1366 = vmatpush.bf16.xpose.msrb.mxu2 %v1357_v50  ;;  %1340 = vmatpush.bf16.xpose.msrb.mxu0 %v1331_v51 }
 0x105   : > { %1288 = vmatpush.bf16.xpose.msrb.mxu1 %v1279_v49 }
 0x106   : > { %v2213_v53 = vmul.f32 -1.442695, %v911_v52 }
 0x107   : > { %v2536_v55 = vpop.eup %2535 }
 0x108   : > { %2537 = vpow2.f32 %v2213_v53  ;;  %v814_v56 = vadd.f32 1.0, %v2536_v55 }
 0x109   : > { %v879_v57 = vpop.f32.mrf.mxu2 }
 0x10a   : > { %2539 = vrcp.f32 %v814_v56  ;;  %v1061_v58 = vpop.f32.mrf.mxu0  ;;  %v1003_v59 = vpop.f32.mrf.mxu3  ;;  %vm820_vm2 = vweird.f32 %v814_v56  ;;  %v826_v24 = vand.u32 2147483648, %v814_v56  ;;  %v824_v27 = vand.u32 2147483647, %v814_v56 }
 0x10b   : > { %v980_v61 = vpop.f32.mrf.mxu1  ;;  %v1004_v1 = vadd.f32 %v1003_v59, %v978_v54 }
 0x10c   : > { %v827_v32 = vor.u32 1.1754944e-38, %v826_v24  ;;  %vm825_vm7 = vcmp.eq.f32.partialorder %v824_v27, 8.507059e+37 }
 0x10d   : > { %v1012_v13 = vadd.f32 %v2533_v2, %v1004_v1 }
 0x10e   : > { %v2538_v60 = vpop.eup %2537 }
 0x10f   : > { %v915_v62 = vadd.f32 1.0, %v2538_v60 }
 0x110   : > { %v2540_v0 = vpop.eup %2539 }
 0x111   : > { %2541 = vrcp.f32 %v915_v62  ;;  %v1086_v3 = vpop.f32.mrf.mxu2  ;;  %v816_v4 = vmul.f32 %v2540_v0, %v814_v56  ;;  %vm821_vm3 = vweird.f32 %v2540_v0  ;;  %v927_v28 = vand.u32 2147483648, %v915_v62 }
 0x112   : > { %v1087_v5 = vadd.f32 %v1086_v3, %v1061_v58  ;;  %v1063_v6 = vpop.f32.mrf.mxu0  ;;  %v1005_v7 = vpop.f32.mrf.mxu3  ;;  %vm822_vm4 = vmor %vm820_vm2, %vm821_vm3  ;;  %v925_v31 = vand.u32 2147483647, %v915_v62  ;;  %vm921_vm6 = vweird.f32 %v915_v62  ;;  %vm1152_vm2 = vcmask 1043459  }
 0x113   : > { %v817_v8 = vsub.f32 1.0, %v816_v4  ;;  %v928_v36 = vor.u32 1.1754944e-38, %v927_v28  ;;  %vm1372_vm3 = vcmask 122880  }
 0x114   : > { %v1095_v9 = vadd.f32 %v2534_v63, %v1087_v5  ;;  %vm926_vm9 = vcmp.eq.f32.partialorder %v925_v31, 8.507059e+37 }
 0x115   : > { %v818_v15 = vmul.f32 %v2540_v0, %v817_v8 }
 0x116   : > { %v2292_v16 = vmul.f32 -1.442695, %v1095_v9 }
 0x117   : > { %v2542_v19 = vpop.eup %2541  ;;  %v819_v23 = vadd.f32 %v2540_v0, %v818_v15 }
 0x118   : > { %v917_v22 = vmul.f32 %v2542_v19, %v915_v62  ;;  %2543 = vpow2.f32 %v2292_v16  ;;  %vm922_vm5 = vweird.f32 %v2542_v19 }
 0x119   : > { %2545 = vtanh.f32 %v1012_v13  ;;  %v1088_v25 = vpop.f32.mrf.mxu2  ;;  %v823_v30 = vsel %vm822_vm4, %v2540_v0, %v819_v23  ;;  %vm923_vm8 = vmor %vm921_vm6, %vm922_vm5  ;;  %vm1470_vm4 = vcmask 130048   ;;  %vm1623_vm5 = vcmask 1044484  }
 0x11a   : > { %v918_v26 = vsub.f32 1.0, %v917_v22  ;;  %v828_v38 = vsel %vm825_vm7, %v827_v32, %v823_v30  ;;  %vm1626_vm6 = vcmask 1045509   ;;  %vm1629_vm7 = vcmask 1046534  }
 0x11c   : > { %v919_v29 = vmul.f32 %v2542_v19, %v918_v26 }
 0x11e   : > { %v2544_v33 = vpop.eup %2543  ;;  %v920_v34 = vadd.f32 %v2542_v19, %v919_v29 }
 0x11f   : > { %v2546_v35 = vpop.eup %2545  ;;  %v1099_v39 = vadd.f32 1.0, %v2544_v33 }
 0x120   : > { %v924_v41 = vsel %vm923_vm8, %v2542_v19, %v920_v34  ;;  %v1116_v47 = vmul.f32 %v2546_v35, %v828_v38  ;;  %vm1632_vm8 = vcmask 1047559  }
 0x121   : > { %v929_v42 = vsel %vm926_vm9, %v928_v36, %v924_v41  ;;  %2547 = vrcp.f32 %v1099_v39  ;;  %v1111_v56 = vand.u32 2147483648, %v1099_v39  ;;  %v1109_v58 = vand.u32 2147483647, %v1099_v39 }
 0x122   : > { %v1115_v46 = vmul.f32 %v929_v42, %v722_v37  ;;  %vm1105_vm11 = vweird.f32 %v1099_v39  ;;  %vm1660_vm9 = vcmask 7168  }
 0x123   : > { %v1112_v60 = vor.u32 1.1754944e-38, %v1111_v56  ;;  %vm1110_vm13 = vcmp.eq.f32.partialorder %v1109_v58, 8.507059e+37 }
 0x124   : > { %v1117_v52 = vadd.f32 %v1116_v47, %v1115_v46 }
 0x126   : > { %1607 = vst.msk [vmem:[%s685_s23] sm:$0xff] %vm760_vm1, %v1117_v52  ;;  %2549 = vtanh.f32 %v1117_v52 }
 0x127   : > { %v2548_v53 = vpop.eup %2547 }
 0x128   : > { %v1101_v54 = vmul.f32 %v2548_v53, %v1099_v39  ;;  %vm1106_vm10 = vweird.f32 %v2548_v53 }
 0x129   : > { %vm1107_vm12 = vmor %vm1105_vm11, %vm1106_vm10 }
 0x12a   : > { %v1102_v55 = vsub.f32 1.0, %v1101_v54 }
 0x12c   : > { %v1103_v57 = vmul.f32 %v2548_v53, %v1102_v55  ;;  %v2550_v62 = vpop.eup %2549 }
 0x12e   : > { %v1104_v59 = vadd.f32 %v2548_v53, %v1103_v57 }
 0x130   : > { %v1108_v61 = vsel %vm1107_vm12, %v2548_v53, %v1104_v59 }
 0x131   : > { %v1113_v63 = vsel %vm1110_vm13, %v1112_v60, %v1108_v61 }
 0x132   : > { %v1119_v0 = vmul.f32 %v2550_v62, %v1113_v63 }
 0x134   : > { %v1136_v1 = vpack.c.bf16 %v1119_v0, %v1119_v0  ;;  %1606 = vst.msk [vmem:[%s678_s26] sm:$0xff] %vm760_vm1, %v1119_v0 }
 0x136   : > { %v1138_v2 = vrot.slane %v1136_v1, 3 }
 0x138   : > { %v1142_v3 = vsel %vm1139_vm14, %v1136_v1, %v1138_v2  ;;  %v1145_v4 = vsel %vm1144_vm15, %v1136_v1, %v1138_v2  ;;  %v1149_v19 = vsel %vm1148_vm0, %v1136_v1, %v1138_v2  ;;  %v1153_v21 = vsel %vm1152_vm2, %v1136_v1, %v1138_v2 }
 0x139   : > { %v2293_v5 = vpack.i.b16 %v1142_v3, %v1142_v3  ;;  %v1157_v6 = vunpack.i.h.s16 %v1142_v3  ;;  %v1147_v7 = vrot.slane %v1145_v4, 1  ;;  %v1151_v22 = vrot.slane %v1149_v19, 2 }
 0x13a   : > { %v1155_v23 = vrot.slane %v1153_v21, 3 }
 0x13b   : > { %v1165_v8 = vperm.slane %v2293_v5, 0  ;;  %v1190_v9 = vpack.i.b16 %v1157_v6, %v1157_v6  ;;  %v2304_v13 = vpack.i.b16 %v1147_v7, %v1147_v7  ;;  %v1159_v15 = vunpack.i.h.s16 %v1147_v7 }
 0x13c   : > { %v1161_v24 = vunpack.i.h.s16 %v1151_v22  ;;  %v2315_v25 = vpack.i.b16 %v1151_v22, %v1151_v22  ;;  %v2326_v27 = vpack.i.b16 %v1155_v23, %v1155_v23 }
 0x13d   : > { %2298 = vmatmul.msk.bf16.vlgmr.msra.gmra.mxu1 %vm760_vm1, %v1165_v8  ;;  %v1191_v16 = vperm.slane %v1190_v9, 0  ;;  %v1217_v17 = vperm.slane %v2304_v13, 0  ;;  %v1242_v18 = vpack.i.b16 %v1159_v15, %v1159_v15 }
 0x13e   : > { %1481 = vmatpush.bf16.msra.mxu1 %v3133_v11  ;;  %v1163_v11 = vunpack.i.h.s16 %v1155_v23  ;;  %v1294_v26 = vpack.i.b16 %v1161_v24, %v1161_v24  ;;  %v1269_v28 = vperm.slane %v2315_v25, 0  ;;  %v1321_v31 = vperm.slane %v2326_v27, 0 }
 0x13f   : > { %2303 = vmatmul.msk.bf16.vlgmr.msra.gmra.mxu3 %vm760_vm1, %v1191_v16  ;;  %2309 = vmatmul.msk.bf16.vlgmr.msra.gmra.mxu0 %vm760_vm1, %v1217_v17  ;;  %v1243_v20 = vperm.slane %v1242_v18, 0 }
 0x140   : > { %1498 = vmatpush.bf16.msra.mxu3 %v3130_v10  ;;  %1515 = vmatpush.bf16.msra.mxu0 %v3139_v14  ;;  %v1346_v29 = vpack.i.b16 %v1163_v11, %v1163_v11  ;;  %v1295_v30 = vperm.slane %v1294_v26, 0 }
 0x141   : > { %2314 = vmatmul.msk.bf16.vlgmr.msra.gmra.mxu2 %vm760_vm1, %v1243_v20 }
 0x142   : > { %1532 = vmatpush.bf16.msra.mxu2 %v3136_v12  ;;  %v1347_v10 = vperm.slane %v1346_v29, 0 }
 0x14d   : > { %2320 = vmatmul.msk.bf16.vlgmr.msrb.gmra.mxu1 %vm760_vm1, %v1269_v28 }
 0x14e   : > { %1549 = vmatpush.bf16.msrb.mxu1 %v3155_v43 }
 0x14f   : > { %2325 = vmatmul.msk.bf16.vlgmr.msrb.gmra.mxu3 %vm760_vm1, %v1295_v30  ;;  %2331 = vmatmul.msk.bf16.vlgmr.msrb.gmra.mxu0 %vm760_vm1, %v1321_v31 }
 0x150   : > { %1566 = vmatpush.bf16.msrb.mxu3 %v3152_v40  ;;  %1583 = vmatpush.bf16.msrb.mxu0 %v3161_v45 }
 0x151   : > { %2336 = vmatmul.msk.bf16.vlgmr.msrb.gmra.mxu2 %vm760_vm1, %v1347_v10 }
 0x152   : > { %1600 = vmatpush.bf16.msrb.mxu2 %v3158_v44 }
 0x1ba   : > { %v1186_v12 = vpop.f32.mrf.mxu1 }
 0x1bb   : > { %v1373_v14 = vsel %vm1372_vm3, %v1186_v12, -inf }
 0x1bc   : > { %v1238_v32 = vpop.f32.mrf.mxu0  ;;  %1374 = vmax.xlane.f32.xlu1 %v1373_v14 }
 0x1bd   : > { %v1379_v35 = vsel %vm1372_vm3, %v1238_v32, -inf }
 0x1c2   : > { %v1188_v33 = vpop.f32.mrf.mxu1  ;;  %v1212_v34 = vpop.f32.mrf.mxu3 }
 0x1c3   : > { %v1376_v36 = vsel %vm1372_vm3, %v1212_v34, -inf }
 0x1c4   : > { %v1240_v37 = vpop.f32.mrf.mxu0  ;;  %v1264_v38 = vpop.f32.mrf.mxu2  ;;  %1380 = vmax.xlane.f32.xlu1 %v1379_v35  ;;  %1377 = vmax.xlane.f32.xlu0 %v1376_v36 }
 0x1c5   : > { %v1382_v41 = vsel %vm1372_vm3, %v1264_v38, -inf }
 0x1ca   : > { %v1214_v39 = vpop.f32.mrf.mxu3  ;;  %v1290_v40 = vpop.f32.mrf.mxu1 }
 0x1cb   : > { %v1385_v47 = vsel %vm1372_vm3, %v1290_v40, -inf }
 0x1cc   : > { %v1266_v42 = vpop.f32.mrf.mxu2  ;;  %v1342_v43 = vpop.f32.mrf.mxu0  ;;  %1383 = vmax.xlane.f32.xlu0 %v1382_v41 }
 0x1cd   : > { %v1391_v44 = vsel %vm1372_vm3, %v1342_v43, -inf }
 0x1ce   : > { %1392 = vmax.xlane.f32.xlu1 %v1391_v44 }
 0x1d2   : > { %v1292_v45 = vpop.f32.mrf.mxu1  ;;  %v1316_v46 = vpop.f32.mrf.mxu3 }
 0x1d3   : > { %v1388_v48 = vsel %vm1372_vm3, %v1316_v46, -inf }
 0x1d4   : > { %v1344_v49 = vpop.f32.mrf.mxu0  ;;  %v1368_v50 = vpop.f32.mrf.mxu2  ;;  %1386 = vmax.xlane.f32.xlu0 %v1385_v47  ;;  %1389 = vmax.xlane.f32.xlu2 %v1388_v48 }
 0x1d5   : > { %v1394_v52 = vsel %vm1372_vm3, %v1368_v50, -inf }
 0x1da   : > { %v1318_v51 = vpop.f32.mrf.mxu3 }
 0x1dc   : > { %v1370_v53 = vpop.f32.mrf.mxu2  ;;  %1395 = vmax.xlane.f32.xlu2 %v1394_v52 }
 0x22f   : > { %v1375_v54 = vpop.xlane.xlu1 %1374 }
 0x230   : > { %v1397_v55 = vsub.f32 %v1186_v12, %v1375_v54 }
 0x232   : > { %v1405_v56 = vmul.f32 1.442695, %v1397_v55 }
 0x234   : > { %2551 = vpow2.f32 %v1405_v56 }
 0x237   : > { %v1378_v57 = vpop.xlane.xlu0 %1377  ;;  %v1381_v58 = vpop.xlane.xlu1 %1380 }
 0x238   : > { %v1398_v59 = vsub.f32 %v1212_v34, %v1378_v57  ;;  %v1399_v62 = vsub.f32 %v1238_v32, %v1381_v58 }
 0x23a   : > { %v2552_v60 = vpop.eup %2551  ;;  %v1407_v61 = vmul.f32 1.442695, %v1398_v59  ;;  %v1409_v0 = vmul.f32 1.442695, %v1399_v62 }
 0x23b   : > { %v1421_v63 = vsel %vm1372_vm3, %v2552_v60, 0.0 }
 0x23c   : > { %1422 = vadd.xlane.f32.xlu1 %v1421_v63  ;;  %2553 = vpow2.f32 %v1407_v61 }
 0x23d   : > { %2555 = vpow2.f32 %v1409_v0 }
 0x23f   : > { %v1384_v1 = vpop.xlane.xlu0 %1383 }
 0x240   : > { %v1400_v2 = vsub.f32 %v1264_v38, %v1384_v1 }
 0x241   : > { %v1393_v8 = vpop.xlane.xlu1 %1392 }
 0x242   : > { %v1411_v3 = vmul.f32 1.442695, %v1400_v2  ;;  %v2554_v4 = vpop.eup %2553  ;;  %v1403_v19 = vsub.f32 %v1342_v43, %v1393_v8 }
 0x243   : > { %v1424_v5 = vsel %vm1372_vm3, %v2554_v4, 0.0  ;;  %v2556_v15 = vpop.eup %2555 }
 0x244   : > { %2557 = vpow2.f32 %v1411_v3  ;;  %1425 = vadd.xlane.f32.xlu2 %v1424_v5  ;;  %v1427_v21 = vsel %vm1372_vm3, %v2556_v15, 0.0  ;;  %v1417_v22 = vmul.f32 1.442695, %v1403_v19  ;;  %v2796_v19 = vmov -1e+30  }
 0x245   : > { %1661 = vst.msk [vmem:[#allocation3] sm:$0xff] %vm1660_vm9, %v2796_v19 }
 0x247   : > { %v1387_v6 = vpop.xlane.xlu0 %1386  ;;  %v1390_v7 = vpop.xlane.xlu2 %1389 }
 0x248   : > { %v1401_v9 = vsub.f32 %v1290_v40, %v1387_v6  ;;  %v1402_v13 = vsub.f32 %v1316_v46, %v1390_v7 }
 0x24a   : > { %v2558_v16 = vpop.eup %2557  ;;  %v1413_v17 = vmul.f32 1.442695, %v1401_v9  ;;  %v1415_v18 = vmul.f32 1.442695, %v1402_v13 }
 0x24b   : > { %v1430_v20 = vsel %vm1372_vm3, %v2558_v16, 0.0 }
 0x24c   : > { %2559 = vpow2.f32 %v1413_v17  ;;  %1431 = vadd.xlane.f32.xlu0 %v1430_v20  ;;  %1428 = vadd.xlane.f32.xlu2 %v1427_v21  ;;  %v2797_v20 = vmov 0.0  }
 0x24d   : > { %2561 = vpow2.f32 %v1415_v18  ;;  %1662 = vst.msk [vmem:[#allocation4] sm:$0xff] %vm1660_vm9, %v2797_v20 }
 0x24e   : > { %2563 = vpow2.f32 %v1417_v22 }
 0x24f   : > { %v1396_v23 = vpop.xlane.xlu2 %1395 }
 0x250   : > { %v1404_v24 = vsub.f32 %v1368_v50, %v1396_v23 }
 0x252   : > { %v2560_v25 = vpop.eup %2559  ;;  %v1419_v11 = vmul.f32 1.442695, %v1404_v24 }
 0x253   : > { %v2562_v26 = vpop.eup %2561  ;;  %v1433_v27 = vsel %vm1372_vm3, %v2560_v25, 0.0 }
 0x254   : > { %2565 = vpow2.f32 %v1419_v11  ;;  %v1436_v28 = vsel %vm1372_vm3, %v2562_v26, 0.0  ;;  %1434 = vadd.xlane.f32.xlu2 %v1433_v27  ;;  %v2564_v29 = vpop.eup %2563 }
 0x255   : > { %1437 = vadd.xlane.f32.xlu0 %v1436_v28  ;;  %v1439_v10 = vsel %vm1372_vm3, %v2564_v29, 0.0 }
 0x25a   : > { %v2566_v30 = vpop.eup %2565 }
 0x25b   : > { %v1442_v31 = vsel %vm1372_vm3, %v2566_v30, 0.0 }
 0x25c   : > { %1443 = vadd.xlane.f32.xlu1 %v1442_v31 }
 0x25d   : > { %1440 = vadd.xlane.f32.xlu0 %v1439_v10 }
 0x2af   : > { %v1423_v12 = vpop.xlane.xlu1 %1422 }
 0x2b0   : > { %2567 = vrcp.f32 %v1423_v12 }
 0x2b6   : > { %v2568_v14 = vpop.eup %2567 }
 0x2b7   : > { %v1453_v32 = vmul.f32 %v2568_v14, %v2552_v60  ;;  %v1426_v33 = vpop.xlane.xlu2 %1425 }
 0x2b8   : > { %2569 = vrcp.f32 %v1426_v33 }
 0x2b9   : > { %v1461_v34 = vpack.c.bf16 %v1453_v32, %v1453_v32 }
 0x2bb   : > { %2337 = vmatmul.msk.bf16.vlgmr.msra.gmra.mxu1 %vm1470_vm4, %v1461_v34 }
 0x2be   : > { %v2570_v35 = vpop.eup %2569 }
 0x2bf   : > { %v1432_v36 = vpop.xlane.xlu0 %1431  ;;  %v1454_v37 = vmul.f32 %v2570_v35, %v2554_v4  ;;  %v1429_v38 = vpop.xlane.xlu2 %1428 }
 0x2c0   : > { %2571 = vrcp.f32 %v1432_v36 }
 0x2c1   : > { %2573 = vrcp.f32 %v1429_v38  ;;  %v1462_v39 = vpack.c.bf16 %v1454_v37, %v1454_v37  ;;  %v1616_v49 = vrot.slane %v1454_v37, 7 }
 0x2c3   : > { %2338 = vmatmul.msk.bf16.vlgmr.msra.gmra.mxu3 %vm1470_vm4, %v1462_v39  ;;  %v1617_v57 = vsel %vm1144_vm15, %v1616_v49, %v1453_v32 }
 0x2c6   : > { %v2572_v40 = vpop.eup %2571 }
 0x2c7   : > { %v2574_v41 = vpop.eup %2573  ;;  %v1456_v42 = vmul.f32 %v2572_v40, %v2558_v16  ;;  %v1435_v45 = vpop.xlane.xlu2 %1434 }
 0x2c8   : > { %v1455_v43 = vmul.f32 %v2574_v41, %v2556_v15  ;;  %v1438_v44 = vpop.xlane.xlu0 %1437 }
 0x2c9   : > { %v1464_v46 = vpack.c.bf16 %v1456_v42, %v1456_v42  ;;  %2575 = vrcp.f32 %v1438_v44  ;;  %v1620_v58 = vrot.slane %v1456_v42, 5 }
 0x2ca   : > { %v1463_v47 = vpack.c.bf16 %v1455_v43, %v1455_v43  ;;  %2577 = vrcp.f32 %v1435_v45  ;;  %v1618_v52 = vrot.slane %v1455_v43, 6 }
 0x2cb   : > { %2340 = vmatmul.msk.bf16.vlgmr.msra.gmra.mxu2 %vm1470_vm4, %v1464_v46 }
 0x2cc   : > { %2339 = vmatmul.msk.bf16.vlgmr.msra.gmra.mxu0 %vm1470_vm4, %v1463_v47  ;;  %v1619_v61 = vsel %vm1148_vm0, %v1618_v52, %v1617_v57 }
 0x2cd   : > { %v1621_v2 = vsel %vm1152_vm2, %v1620_v58, %v1619_v61 }
 0x2cf   : > { %v2576_v48 = vpop.eup %2575  ;;  %v1444_v50 = vpop.xlane.xlu1 %1443 }
 0x2d0   : > { %v2578_v51 = vpop.eup %2577  ;;  %v1458_v53 = vmul.f32 %v2576_v48, %v2562_v26  ;;  %v1441_v54 = vpop.xlane.xlu0 %1440  ;;  %2579 = vrcp.f32 %v1444_v50 }
 0x2d1   : > { %v1457_v55 = vmul.f32 %v2578_v51, %v2560_v25  ;;  %2581 = vrcp.f32 %v1441_v54 }
 0x2d2   : > { %v1466_v56 = vpack.c.bf16 %v1458_v53, %v1458_v53  ;;  %v1625_v0 = vrot.slane %v1458_v53, 3 }
 0x2d3   : > { %v1465_v59 = vpack.c.bf16 %v1457_v55, %v1457_v55  ;;  %v1622_v60 = vrot.slane %v1457_v55, 4 }
 0x2d4   : > { %2342 = vmatmul.msk.bf16.vlgmr.msrb.gmra.mxu3 %vm1470_vm4, %v1466_v56 }
 0x2d5   : > { %2341 = vmatmul.msk.bf16.vlgmr.msrb.gmra.mxu1 %vm1470_vm4, %v1465_v59  ;;  %v1624_v4 = vsel %vm1623_vm5, %v1622_v60, %v1621_v2 }
 0x2d6   : > { %v2580_v62 = vpop.eup %2579  ;;  %v1627_v9 = vsel %vm1626_vm6, %v1625_v0, %v1624_v4 }
 0x2d7   : > { %v2582_v63 = vpop.eup %2581  ;;  %v1460_v1 = vmul.f32 %v2580_v62, %v2566_v30 }
 0x2d8   : > { %v1459_v3 = vmul.f32 %v2582_v63, %v2564_v29 }
 0x2d9   : > { %v1468_v5 = vpack.c.bf16 %v1460_v1, %v1460_v1  ;;  %v1631_v6 = vrot.slane %v1460_v1, 1 }
 0x2da   : > { %v1467_v7 = vpack.c.bf16 %v1459_v3, %v1459_v3  ;;  %v1628_v8 = vrot.slane %v1459_v3, 2 }
 0x2db   : > { %2344 = vmatmul.msk.bf16.vlgmr.msrb.gmra.mxu2 %vm1470_vm4, %v1468_v5 }
 0x2dc   : > { %2343 = vmatmul.msk.bf16.vlgmr.msrb.gmra.mxu0 %vm1470_vm4, %v1467_v7  ;;  %v1630_v13 = vsel %vm1629_vm7, %v1628_v8, %v1627_v9 }
 0x2dd   : > { %v1633_v15 = vsel %vm1632_vm8, %v1631_v6, %v1630_v13 }
 0x2de   : > { %1635 = vst.msk [vmem:[%s3408_s21] sm:$0xff] %vm1470_vm4, %v1633_v15 }
 0x338   : > { %v1483_v16 = vpop.f32.mrf.mxu1 }
 0x340   : > { %v1485_v17 = vpop.f32.mrf.mxu1 }
 0x346   : > { %v1500_v18 = vpop.f32.mrf.mxu3 }
 0x347   : > { %v1644_v24 = vrot.slane %v1500_v18, 7 }
 0x349   : > { %v1517_v21 = vpop.f32.mrf.mxu0  ;;  %v1645_v27 = vsel %vm1144_vm15, %v1644_v24, %v1483_v16 }
 0x34a   : > { %v1646_v26 = vrot.slane %v1517_v21, 6 }
 0x34c   : > { %v1647_v31 = vsel %vm1148_vm0, %v1646_v26, %v1645_v27 }
 0x34e   : > { %v1534_v22 = vpop.f32.mrf.mxu2  ;;  %v1502_v23 = vpop.f32.mrf.mxu3 }
 0x34f   : > { %v1648_v28 = vrot.slane %v1534_v22, 5 }
 0x351   : > { %v1519_v25 = vpop.f32.mrf.mxu0  ;;  %v1649_v12 = vsel %vm1152_vm2, %v1648_v28, %v1647_v31 }
 0x352   : > { %v1551_v11 = vpop.f32.mrf.mxu1 }
 0x353   : > { %v1650_v10 = vrot.slane %v1551_v11, 4 }
 0x355   : > { %v1651_v34 = vsel %vm1623_vm5, %v1650_v10, %v1649_v12 }
 0x356   : > { %v1536_v29 = vpop.f32.mrf.mxu2 }
 0x357   : > { %v1568_v30 = vpop.f32.mrf.mxu3 }
 0x358   : > { %v1652_v14 = vrot.slane %v1568_v30, 3 }
 0x359   : > { %v1585_v32 = vpop.f32.mrf.mxu0 }
 0x35a   : > { %v1553_v33 = vpop.f32.mrf.mxu1  ;;  %v1654_v35 = vrot.slane %v1585_v32, 2  ;;  %v1653_v36 = vsel %vm1626_vm6, %v1652_v14, %v1651_v34 }
 0x35c   : > { %v1655_v40 = vsel %vm1629_vm7, %v1654_v35, %v1653_v36 }
 0x35e   : > { %v1602_v37 = vpop.f32.mrf.mxu2 }
 0x35f   : > { %v1570_v38 = vpop.f32.mrf.mxu3  ;;  %v1656_v39 = vrot.slane %v1602_v37, 1 }
 0x361   : > { %v1657_v41 = vsel %vm1632_vm8, %v1656_v39, %v1655_v40  ;;  %v1587_v42 = vpop.f32.mrf.mxu0 }
 0x362   : > { %1659 = vst.msk [vmem:[#allocation2] sm:$0xff] %vm760_vm1, %v1657_v41 }
 0x366   : > { %v1604_v43 = vpop.f32.mrf.mxu2 }
 0x367 PF: > { %v2423_v44 = vld [vmem:[%s3027_s11 + $0x18] sm:$0xff]  ;;  %s3445_s25 = scalar_lea.vmem [#allocation5], %s2985_s24  ;;  %v2422_v46 = vld [vmem:[%s3027_s11 + $0x10] sm:$0xff]  ;;  %v1663_v48 = vld [vmem:[%s3002_s8] sm:$0xf]  ;;  %vm1731_vm1 = vcmask 261120   ;;  %s3447_s27 = scalar_lea.vmem %s3383_s9, %s3020_s16 }
 0x368   : > { %v2419_v45 = vld [vmem:[%s3445_s25 + $0x8] sm:$0xff]  ;;  %1710 = vmatpush.bf16.msra.mxu0 %v2423_v44  ;;  %s3446_s28 = smov %s3445_s25  ;;  %v2420_v50 = vld [vmem:[%s3027_s11] sm:$0xff]  ;;  %vm1702_vm10 = vcmask 523264   ;;  %s2371_s7 = sshll.u32 %s2778_s30, 7  ;;  %v2798_v60 = vmov 0   ;;  %v1755_v61 = vld [vmem:[#allocation3] sm:$0xff] }
 0x369   : > { %1741 = vmatpush.bf16.msra.mxu1 %v2419_v45  ;;  %v2418_v47 = vld [vmem:[%s3446_s28] sm:$0xff]  ;;  %s1777_s24 = sshra.s32 %s2371_s7, 7  ;;  %2583 = vset.pattern.permute.xlu0 %v2798_v60  ;;  %vm1773_vm11 = vcmask 7168   ;;  %v1757_v7 = vld [vmem:[#allocation4] sm:$0xff]  ;;  %p2373_p7 = scmp.ne.s32.totalorder %s2778_s30, 1 }
 0x36a   : > { %v2421_v49 = vld [vmem:[%s3027_s11 + $0x8] sm:$0xff]  ;;  %s2372_s8 = sshll.u32 %s1777_s24, 3 }
 0x36b   : > { %v1664_v51 = vld [vmem:[#allocation2] sm:$0xff]  ;;  %s1780_s19 = scalar_lea.vmem %s3029_s0, %s2372_s8 [#allocation7] }
 0x36c   : > { %1711 = vmatpush.bf16.msra.mxu0 %v2422_v46  ;;  %v1665_v52 = vpack.c.bf16 %v1664_v51, %v1664_v51  ;;  %v2584_v54 = vld [vmem:[%s3447_s27] ss:$0 sm:$0xff] }
 0x36d   : > { %1742 = vmatpush.bf16.msra.mxu1 %v2418_v47 }
 0x370   : > { %2370 = vmatmul.msk.bf16.vlgmr.msra.gmra.mxu1 %vm1731_vm1, %v1663_v48  ;;  %1712 = vmatpush.bf16.msra.mxu0 %v2421_v49 }
 0x374   : > { %1713 = vmatpush.bf16.msra.mxu0 %v2420_v50 }
 0x377   : > { %2361 = vmatmul.msk.bf16.vlgmr.msra.gmra.mxu0 %vm1702_vm10, %v1665_v52 }
 0x3ed   : > { %v1744_v53 = vpop.f32.mrf.mxu1 }
 0x3f4   : > { %v1715_v55 = vpop.f32.mrf.mxu0 }
 0x3f5   : > { %v1746_v56 = vpop.f32.mrf.mxu1  ;;  %v1745_v57 = vadd.f32 %v1744_v53, %v1715_v55 }
 0x3f7   : > { %v1752_v58 = vadd.f32 %v2584_v54, %v1745_v57 }
 0x3f9   : > { %1781 = vst [vmem:[%s1780_s19] sm:$0xff] %v1752_v58  ;;  %1753 = vmax.xlane.f32.xlu0 %v1752_v58 }
 0x3fc   : > { %v1717_v59 = vpop.f32.mrf.mxu0 }
 0x46c   : > { %v1754_v62 = vpop.xlane.xlu0 %1753 }
 0x46d   : > { %v1756_v63 = vmax.f32 %v1755_v61, %v1754_v62 }
 0x46f   : > { %v1758_v0 = vsub.f32 %v1755_v61, %v1756_v63  ;;  %1775 = vst.msk [vmem:[#allocation3] sm:$0xff] %vm1773_vm11, %v1756_v63  ;;  %1764 = vperm.xlu0 %2583, %v1756_v63  }
 0x471   : > { %v1759_v5 = vmul.f32 1.442695, %v1758_v0 }
 0x4e1   : > { %v1765_v1 = vpop.permute.xlu0 %1764 }
 0x4e2   : > { %v1767_v2 = vsub.f32 %v1752_v58, %v1765_v1 }
 0x4e4   : > { %v1768_v3 = vmul.f32 1.442695, %v1767_v2 }
 0x4e6   : > { %2585 = vpow2.f32 %v1768_v3 }
 0x4e7   : > { %2587 = vpow2.f32 %v1759_v5 }
 0x4ec   : > { %v2586_v4 = vpop.eup %2585 }
 0x4ed   : > { %1770 = vadd.xlane.f32.xlu1 %v2586_v4  ;;  %v2588_v6 = vpop.eup %2587 }
 0x4ee   : > { %v1761_v8 = vmul.f32 %v2588_v6, %v1757_v7 }
 0x55f   : > { %1785 = sbr.rel (%p2373_p7) target bundleno = 1517 (0x5ed), region = 150 }
 0x560   : > { %v1771_v9 = vpop.xlane.xlu1 %1770 }
 0x561   : > { %v1772_v13 = vadd.f32 %v1771_v9, %v1761_v8 }
 0x563   : > { %1774 = vst.msk [vmem:[#allocation4] sm:$0xff] %vm1773_vm11, %v1772_v13 }
 0x564   : > { %v2799_v16 = vmov 0   ;;  %v1786_v18 = vld [vmem:[#allocation3] sm:$0xff]  ;;  %v1792_v22 = vld [vmem:[%s3029_s0 + $0x8] sm:$0xff] }
 0x565   : > { %2589 = vset.pattern.permute.xlu0 %v2799_v16  ;;  %v1791_v21 = vld [vmem:[%s3029_s0] sm:$0xff] }
 0x56a   : > { %v1787_v15 = vld [vmem:[#allocation4] sm:$0xff] }
 0x56b   : > { %2590 = vlog2.f32 %v1787_v15 }
 0x571   : > { %v2591_v17 = vpop.eup %2590 }
 0x572   : > { %v1789_v19 = vmul.f32 0.6931472, %v2591_v17 }
 0x574   : > { %v1790_v20 = vadd.f32 %v1789_v19, %v1786_v18 }
 0x576   : > { %1795 = vperm.xlu0 %2589, %v1790_v20  }
 0x5e8   : > { %v1796_v23 = vpop.permute.xlu0 %1795 }
 0x5e9   : > { %v1798_v24 = vsub.f32 %v1791_v21, %v1796_v23  ;;  %v1799_v25 = vsub.f32 %v1792_v22, %v1796_v23 }
 0x5eb   : > { %1800 = vst [vmem:[%s3029_s0] sm:$0xff] %v1798_v24 }
 0x5ec   : > { %1801 = vst [vmem:[%s3029_s0 + $0x8] sm:$0xff] %v1799_v25 }
 0x5ed PF: > { %s3448_s30 = sadd.s32 4294967295, %s2794_s17   ;;  %s3449_s16 = sld [smem:[#allocation31_spill]] }
 0x5ee   : > { %s3263_s29 = sand.u32 1, %s3448_s30   ;;  %s3451_s20 = sld [smem:[#allocation39_spill]] }
 0x5ef   : > { %s1845_s22 = sshll.u32 %s678_s26, 4  ;;  %s1808_s28 = scalar_lea.sflag [#allocation10], %s3263_s29  ;;  %s1846_s22 = int_to_ptr.vmem [resolvable:$true] %s1845_s22 }
 0x5f4   : > { %s1843_s18 = scalar_lea.hbm %s3451_s20, %s3449_s16  ;;  %s2612_s27 = scalar_lea.hbm %s3451_s20, 16 }
 0x5f5   : > { %s1847_s25 = sshll.u32 %s1843_s18, 4  ;;  %s1848_s25 = int_to_ptr.hbm [resolvable:$true] %s1847_s25 }
 0x5f6   : > { %s2606_s7 = sshra.s32 %s1848_s25, 4  ;;  %s2607_s7 = int_to_ptr.hbm [resolvable:$true] %s2606_s7 }
 0x5f7   : > { %s2608_s24 = scalar_lea.hbm %s2607_s7, 8  ;;  %p2613_p13 = scmp.lt.s32.totalorder %s2607_s7, %s3451_s20 }
 0x5f8   : > { %p2609_p8 = scmp.ne.s32.totalorder %s2607_s7, %s2608_s24  ;;  %p2614_p0 = scmp.lt.s32.totalorder %s2612_s27, %s2608_s24 }
 0x5fa   : > { %p2610_p9 = pnand %p2609_p8, %p2951_p10  ;;  %p2615_p1 = por %p2614_p0, %p2613_p13 }
 0x5fc   : > { %p2611_p11 = pneg %p2610_p9 }
 0x5fe   : > { %p2616_p2 = pnand %p2615_p1, %p2611_p11 }
 0x600   : > { %2619 = shalt.err (!%p2616_p2)
}
 0x601   : > { %s3452_s26 = sld [smem:[#allocation21_spill]]  ;;  %s1831_s14 = sshll.u32 %s3029_s0, 4  ;;  %s1832_s14 = int_to_ptr.vmem [resolvable:$true] %s1831_s14 }
 0x602   : > { %s3453_s30 = sld [smem:[#allocation30_spill]]  ;;  %s3295_s1 = sshll.u32 %s685_s23, 4  ;;  %s1860_s1 = int_to_ptr.vmem [resolvable:$true] %s3295_s1 }
 0x603   : > { %2426 = dma.vmem_to_hbm [thread:$0]  (%p2951_p10), %s1846_s22, 128, %s1848_s25, %s1808_s28  }
 0x604   : > { %s3454_s7 = sld [smem:[#allocation38_spill]] }
 0x605   : > { %s3455_s19 = sld [smem:[#allocation40_spill]] }
 0x607   : > { %s2424_s15 = sshll.u32 %s3452_s26, 4 }
 0x608   : > { %s1803_s2 = scalar_lea.sflag [#allocation8], %s3453_s30 }
 0x60a   : > { %s1829_s24 = scalar_lea.hbm %s3454_s7, %s2424_s15  ;;  %s2640_s26 = scalar_lea.hbm %s3454_s7, 32 }
 0x60b   : > { %s1833_s10 = sshll.u32 %s1829_s24, 4  ;;  %s1857_s21 = scalar_lea.hbm %s3455_s19, %s3449_s16  ;;  %s1834_s10 = int_to_ptr.hbm [resolvable:$true] %s1833_s10 }
 0x60c   : > { %s2634_s3 = sshra.s32 %s1834_s10, 4  ;;  %s2635_s3 = int_to_ptr.hbm [resolvable:$true] %s2634_s3 }
 0x60d   : > { %s2636_s22 = scalar_lea.hbm %s2635_s3, 16  ;;  %p2641_p6 = scmp.lt.s32.totalorder %s2635_s3, %s3454_s7 }
 0x60e   : > { %p2637_p3 = scmp.ne.s32.totalorder %s2635_s3, %s2636_s22  ;;  %p2642_p7 = scmp.lt.s32.totalorder %s2640_s26, %s2636_s22 }
 0x610   : > { %p2638_p4 = pnand %p2637_p3, %p2951_p10  ;;  %p2643_p8 = por %p2642_p7, %p2641_p6 }
 0x612   : > { %p2639_p5 = pneg %p2638_p4 }
 0x614   : > { %p2644_p9 = pnand %p2643_p8, %p2639_p5 }
 0x616   : > { %2647 = shalt.err (!%p2644_p9)
}
 0x617   : > { %2425 = dma.vmem_to_hbm [thread:$0]  (%p2951_p10), %s1832_s14, 256, %s1834_s10, %s1803_s2  }
 0x618   : > { %s1861_s23 = sshll.u32 %s1857_s21, 4  ;;  %s2668_s8 = scalar_lea.hbm %s3455_s19, 16  ;;  %s1862_s23 = int_to_ptr.hbm [resolvable:$true] %s1861_s23 }
 0x619   : > { %s2662_s13 = sshra.s32 %s1862_s23, 4  ;;  %s2663_s13 = int_to_ptr.hbm [resolvable:$true] %s2662_s13 }
 0x61a   : > { %s2664_s24 = scalar_lea.hbm %s2663_s13, 8  ;;  %p2669_p1 = scmp.lt.s32.totalorder %s2663_s13, %s3455_s19 }
 0x61b   : > { %p2665_p11 = scmp.ne.s32.totalorder %s2663_s13, %s2664_s24  ;;  %p2670_p2 = scmp.lt.s32.totalorder %s2668_s8, %s2664_s24 }
 0x61d   : > { %p2666_p13 = pnand %p2665_p11, %p2951_p10  ;;  %p2671_p3 = por %p2670_p2, %p2669_p1 }
 0x61f   : > { %p2667_p0 = pneg %p2666_p13 }
 0x621   : > { %p2672_p4 = pnand %p2671_p3, %p2667_p0 }
 0x623   : > { %2675 = shalt.err (!%p2672_p4)
}
 0x624   : > { %2427 = dma.vmem_to_hbm [thread:$0]  (%p2951_p10), %s1860_s1, 128, %s1862_s23, %s1808_s28  }
 0x625   : > { %s3456_s14 = sld [smem:[#allocation41_spill]]  ;;  %s3458_s26 = scalar_lea.vmem [#allocation12], %s2989_s12 }
 0x626   : > { %s1873_s15 = sshll.u32 %s3458_s26, 4  ;;  %s1818_s13 = scalar_lea.sflag [#allocation13], %s3453_s30  ;;  %s1874_s15 = int_to_ptr.vmem [resolvable:$true] %s1873_s15 }
 0x62b   : > { %s3457_s10 = smov %s3456_s14  ;;  %s1871_s25 = scalar_lea.hbm %s3456_s14, %s3449_s16 }
 0x62c   : > { %s1875_s18 = sshll.u32 %s1871_s25, 4  ;;  %s2696_s1 = scalar_lea.hbm %s3457_s10, 16  ;;  %s1876_s18 = int_to_ptr.hbm [resolvable:$true] %s1875_s18 }
 0x62d   : > { %s2690_s24 = sshra.s32 %s1876_s18, 4  ;;  %s2691_s24 = int_to_ptr.hbm [resolvable:$true] %s2690_s24 }
 0x62e   : > { %s2692_s3 = scalar_lea.hbm %s2691_s24, 8  ;;  %p2697_p8 = scmp.lt.s32.totalorder %s2691_s24, %s3457_s10 }
 0x62f   : > { %p2693_p5 = scmp.ne.s32.totalorder %s2691_s24, %s2692_s3  ;;  %p2698_p9 = scmp.lt.s32.totalorder %s2696_s1, %s2692_s3 }
 0x631   : > { %p2694_p6 = pnand %p2693_p5, %p2951_p10  ;;  %p2699_p11 = por %p2698_p9, %p2697_p8 }
 0x633   : > { %p2695_p7 = pneg %p2694_p6 }
 0x635   : > { %p2700_p13 = pnand %p2699_p11, %p2695_p7 }
 0x637   : > { %2703 = shalt.err (!%p2700_p13)
}
 0x638   : > { %2428 = dma.vmem_to_hbm [thread:$0]  (%p2951_p10), %s1874_s15, 128, %s1876_s18, %s1818_s13  }
 0x639 PF: > { %s3459_s12 = sld [smem:[#allocation17_spill]]  ;;  %p2446_p0 = scmp.ge.s32.totalorder %s2794_s17, 2 }
 0x63b   : > { %p2434_p1 = pnand %p2446_p0, %p2960_p12 }
 0x63d   : > { %p2435_p2 = pneg %p2434_p1 }
 0x63f   : > { %s1887_s30 = sand.u32 1, %s3459_s12  }
 0x640   : > { %s1888_s8 = scalar_lea.sflag [#allocation8], %s1887_s30 }
 0x641   : > { %2745 = dma.done.wait (%p2435_p2), %s1888_s8, 256  }
 0x642   : > { %2747 = vsyncadd (%p2435_p2), %s1888_s8, 4294967040  ;;  %s3461_s22 = sadd.s32 4294967294, %s2794_s17  }
 0x643   : > { %s1897_s0 = sand.u32 1, %s3461_s22  }
 0x644   : > { %s1898_s2 = scalar_lea.sflag [#allocation10], %s1897_s0 }
 0x645   : > { %2749 = dma.done.wait (%p2435_p2), %s1898_s2, 256  }
 0x646   : > { %2751 = vsyncadd (%p2435_p2), %s1898_s2, 4294967040  ;;  %s1918_s11 = scalar_lea.sflag [#allocation13], %s1887_s30 }
 0x647   : > { %2753 = dma.done.wait (%p2435_p2), %s1918_s11, 128  }
 0x648   : > { %2755 = vsyncadd (%p2435_p2), %s1918_s11, 4294967168  ;;  %s33_s17 = sadd.s32 1, %s2794_s17   ;;  %s3462_s25 = sld [smem:[#allocation18_spill]] }
 0x649   : > { %p30_p10 = scmp.ge.s32.totalorder %s33_s17, 6   ;;  %s3463_s26 = sld [smem:[#allocation19_spill]] }
 0x64a   : > { %s3464_s27 = sld [smem:[#allocation28_spill]] }
 0x64b   : > { %s3465_s28 = sld [smem:[#allocation20_spill]] }
 0x64c   : > { %s3466_s29 = sld [smem:[#allocation26_spill]]  ;;  %32 = sbr.rel (!%p30_p10) target bundleno = 21 (0x15), region = 272 }
 0x64d   : > { %s3467_s30 = sld [smem:[#allocation22_spill]] }
 0x64e   : > { %s3468_s14 = sld [smem:[#allocation23_spill]] }
 0x64f   : > { %s3469_s15 = sld [smem:[#allocation24_spill]] }
 0x650   : > { %s3470_s16 = sld [smem:[#allocation25_spill]] }
 0x651   :  { %1924 = vsyncpa [#allocation8], 1 }
 0x652   :  { %1926 = vsyncpa [#allocation8 + $0x1], 1 }
 0x653   :  { %1927 = vsyncpa [#allocation10], 1 }
 0x654   :  { %1929 = vsyncpa [#allocation10 + $0x1], 1 }
 0x655   :  { %1930 = vsyncpa [#allocation13], 1 }
 0x656   :  { %1932 = vsyncpa [#allocation13 + $0x1], 1 }

</bundles_post_ra>
